<compile_context>
chip_gen: v7x
topology: tpu7x:2x2x1
jax: 0.10.0
libtpu: 0.0.40
codegen_flags: <defaults>
</compile_context>

<pallas_src>
import functools

import numpy as np

import jax
import jax.numpy as jnp
from jax.experimental import pallas as pl
from jax.experimental.pallas import tpu as pltpu


_VMEM_LIMIT = 32 * 1024 * 1024  # explicit (fits v7x's 32 MiB scoped default)


# ----------------------------- helpers (trace-time) -------------------------

def _tap_deltas(W):
    """Flat lane shift for each of the nine 3x3 taps (kh-major, kw-minor)."""
    return tuple((kh - 1) * W + (kw - 1) for kh in range(3) for kw in range(3))


def _col_masks(H, W):
    """(2, 1, H*W) f32: [0]=valid for kw=0 taps (w>0), [1]=valid for kw=2 (w<W-1)."""
    w = np.arange(H * W) % W
    left = (w != 0).astype(np.float32)
    right = (w != W - 1).astype(np.float32)
    return jnp.asarray(np.stack([left, right])[:, None, :])


# ------------------------------- fused kernel -------------------------------

def _fused_kernel(x_ref, w1_ref, b1_ref, m_ref, g_ref, bt_ref, *rest,
                  N, Cin, Cout, H, W, bn_c, with_conv2, mm_dtype):
    """conv1 + IBNorm + ReLU (+ conv2 + sigmoid), whole batch VMEM-resident.

    x_ref:  (N, Cin, L)        flat input (no pre-pad; halo built in-kernel)
    w1_ref: (Cout, 9*cin_pad)  stacked per-tap conv1 weights (mm_dtype)
    b1_ref: (Cout, 1)          conv1 bias
    m_ref:  (2, 1, L)          left / right column-border masks
    g_ref, bt_ref: (Cout, 1)   IBNorm affine (ones/zeros for IN channels)
    if with_conv2: rest = (w2_ref (9,Cout,1), b2_ref (1,1),
                           lr_ref (N,Cout,L), pred_ref (N,1,L), patch_ref)
    else:          rest = (lr_ref (N,Cout,L), patch_ref)
    patch_ref: (9*cin_pad, N*L) VMEM scratch for the stacked im2col operand.
    """
    if with_conv2:
        w2_ref, b2_ref, lr_ref, pred_ref, patch_ref = rest
    else:
        lr_ref, patch_ref = rest

    L = H * W
    halo = W + 1
    eps = 1e-5
    deltas = _tap_deltas(W)
    cin_pad = patch_ref.shape[0] // 9

    # Masks: read & cast exactly once (hoisted out of the tap loops).
    m_left_f = m_ref[0]                                   # (1, L) f32
    m_right_f = m_ref[1]
    m_left = m_left_f.astype(mm_dtype)
    m_right = m_right_f.astype(mm_dtype)

    # -------- phase 1: stacked im2col patches (halo built in-kernel) --------
    patch_ref[...] = jnp.zeros_like(patch_ref)            # zero pad rows once
    for n in range(N):
        xn = x_ref[n].astype(mm_dtype)                    # (Cin, L)
        zh = jnp.zeros((Cin, halo), mm_dtype)
        xe = jnp.concatenate([zh, xn, zh], axis=1)        # (Cin, L + 2*halo)
        for t, d in enumerate(deltas):
            sl = xe[:, halo + d: halo + d + L]            # static lane shift
            kw = t % 3
            if kw == 0:
                sl = sl * m_left
            elif kw == 2:
                sl = sl * m_right
            # kw == 1: zero halo already handles out-of-range rows, no mask.
            patch_ref[t * cin_pad: t * cin_pad + Cin,
                      n * L:(n + 1) * L] = sl

    # -------- phase 2: conv1 as a single MXU matmul + bias -------------------
    y = jnp.dot(w1_ref[...], patch_ref[...],
                preferred_element_type=jnp.float32)       # (Cout, N*L)
    y = y + b1_ref[...]

    # -------- phase 3: IBNorm statistics (in-kernel, no XLA glue) ------------
    inv_L = 1.0 / float(L)
    s_list, q_list = [], []
    for n in range(N):
        yn = y[:, n * L:(n + 1) * L]
        s_list.append(jnp.sum(yn, axis=1, keepdims=True))        # (Cout, 1)
        q_list.append(jnp.sum(yn * yn, axis=1, keepdims=True))
    s_tot, q_tot = s_list[0], q_list[0]
    for n in range(1, N):
        s_tot = s_tot + s_list[n]
        q_tot = q_tot + q_list[n]
    inv_NL = 1.0 / float(N * L)
    bn_mean = s_tot * inv_NL                              # BatchNorm (per c)
    bn_var = q_tot * inv_NL - bn_mean * bn_mean

    chan = jax.lax.broadcasted_iota(jnp.int32, (Cout, 1), 0)
    use_bn = chan < bn_c
    gamma = g_ref[...]
    beta = bt_ref[...]

    # -------- phase 4: normalize + ReLU (+ conv2 + sigmoid) per sample -------
    for n in range(N):
        in_mean = s_list[n] * inv_L                       # InstanceNorm (n, c)
        in_var = q_list[n] * inv_L - in_mean * in_mean
        mean = jnp.where(use_bn, bn_mean, in_mean)
        var = jnp.where(use_bn, bn_var, in_var)
        rstd = jax.lax.rsqrt(var + eps)                   # EUP
        scale = gamma * rstd
        shift = beta - mean * scale
        lr = jnp.maximum(y[:, n * L:(n + 1) * L] * scale + shift, 0.0)
        lr_ref[n] = lr                                    # (Cout, L) lane-dense

        if with_conv2:
            # conv2 (3x3, pad 1) on the VPU (Cout=1 -> no 1-lane MXU matmul).
            zh2 = jnp.zeros((Cout, halo), lr.dtype)
            lre = jnp.concatenate([zh2, lr, zh2], axis=1)  # (Cout, L + 2*halo)
            acc = jnp.zeros((Cout, L), jnp.float32)
            for t, d in enumerate(deltas):
                sl = lre[:, halo + d: halo + d + L]
                kw = t % 3
                if kw == 0:
                    sl = sl * m_left_f
                elif kw == 2:
                    sl = sl * m_right_f
                acc = acc + sl * w2_ref[t]                # (Cout, 1) broadcast
            logits = jnp.sum(acc, axis=0, keepdims=True) + b2_ref[...]  # (1, L)
            pred_ref[n] = jax.nn.sigmoid(logits)          # EUP


# ------------------------------ kernel wrapper -------------------------------

def _fused_call(x_flat, w1s, b1, masks, gamma, beta, w2s, b2, *,
                N, Cin, Cout, H, W, bn_c, with_conv2, mm_dtype):
    L = H * W
    cin_pad = ((Cin + 7) // 8) * 8
    kern = functools.partial(_fused_kernel, N=N, Cin=Cin, Cout=Cout, H=H, W=W,
                             bn_c=bn_c, with_conv2=with_conv2,
                             mm_dtype=mm_dtype)
    in_specs = [
        pl.BlockSpec((N, Cin, L), lambda i: (0, 0, 0)),
        pl.BlockSpec((Cout, 9 * cin_pad), lambda i: (0, 0)),
        pl.BlockSpec((Cout, 1), lambda i: (0, 0)),
        pl.BlockSpec((2, 1, L), lambda i: (0, 0, 0)),
        pl.BlockSpec((Cout, 1), lambda i: (0, 0)),
        pl.BlockSpec((Cout, 1), lambda i: (0, 0)),
    ]
    args = [x_flat, w1s, b1, masks, gamma, beta]
    out_shape = [jax.ShapeDtypeStruct((N, Cout, L), jnp.float32)]
    out_specs = [pl.BlockSpec((N, Cout, L), lambda i: (0, 0, 0))]
    if with_conv2:
        in_specs += [
            pl.BlockSpec((9, Cout, 1), lambda i: (0, 0, 0)),
            pl.BlockSpec((1, 1), lambda i: (0, 0)),
        ]
        args += [w2s, b2]
        out_shape.append(jax.ShapeDtypeStruct((N, 1, L), jnp.float32))
        out_specs.append(pl.BlockSpec((N, 1, L), lambda i: (0, 0, 0)))
    return pl.pallas_call(
        kern,
        out_shape=tuple(out_shape),
        grid_spec=pltpu.PrefetchScalarGridSpec(
            num_scalar_prefetch=0,
            grid=(1,),
            in_specs=tuple(in_specs),
            out_specs=tuple(out_specs),
            scratch_shapes=[pltpu.VMEM((9 * cin_pad, N * L), mm_dtype)],
        ),
        compiler_params=pltpu.CompilerParams(
            dimension_semantics=("arbitrary",),
            vmem_limit_bytes=_VMEM_LIMIT,
        ),
    )(*args)


# ------------------------------ forward pass --------------------------------

@functools.partial(jax.jit, static_argnames=("inference", "bn_c", "mm_dtype"))
def layer2_forward(params, x_nchw, *, inference, bn_c, mm_dtype=jnp.float32):
    w1, b1 = params["w1"], params["b1"]
    w2, b2 = params["w2"], params["b2"]
    bn_gamma, bn_beta = params["bn_gamma"], params["bn_beta"]

    N, Cin, H, W = x_nchw.shape
    Cout = w1.shape[0]
    L = H * W
    cin_pad = ((Cin + 7) // 8) * 8

    # Flatten spatial dims onto lanes; NO activation pad (halo built in-kernel).
    x_flat = x_nchw.astype(jnp.float32).reshape(N, Cin, L)
    masks = _col_masks(H, W)

    # Stacked conv1 weights: w1s[o, t*cin_pad + c] = w1[o, c, kh, kw], t=kh*3+kw
    w1r = jnp.transpose(w1, (0, 2, 3, 1))                   # (Cout, 3, 3, Cin)
    w1r = jnp.pad(w1r, ((0, 0), (0, 0), (0, 0), (0, cin_pad - Cin)))
    w1s = w1r.reshape(Cout, 9 * cin_pad).astype(mm_dtype)

    # Full-length affine params (ones/zeros for the InstanceNorm channels).
    gamma_full = jnp.concatenate(
        [bn_gamma, jnp.ones((Cout - bn_c,), jnp.float32)]).reshape(Cout, 1)
    beta_full = jnp.concatenate(
        [bn_beta, jnp.zeros((Cout - bn_c,), jnp.float32)]).reshape(Cout, 1)

    if inference:
        (lr_flat,) = _fused_call(
            x_flat, w1s, b1.reshape(Cout, 1), masks, gamma_full, beta_full,
            None, None, N=N, Cin=Cin, Cout=Cout, H=H, W=W, bn_c=bn_c,
            with_conv2=False, mm_dtype=mm_dtype)
        pred = jnp.zeros((0,), jnp.float32)     # mirrors torch.tensor([])
    else:
        w2s = jnp.transpose(w2, (2, 3, 1, 0)).reshape(9, Cout, 1)
        lr_flat, pred_full = _fused_call(
            x_flat, w1s, b1.reshape(Cout, 1), masks, gamma_full, beta_full,
            w2s, b2.reshape(1, 1), N=N, Cin=Cin, Cout=Cout, H=H, W=W,
            bn_c=bn_c, with_conv2=True, mm_dtype=mm_dtype)
        # stride-2 selection of the full-resolution conv2 map (tiny, jitted).
        pred = pred_full.reshape(N, 1, H, W)[:, :, ::2, ::2]

    lr8x = lr_flat.reshape(N, Cout, H, W)        # already NCHW
    return pred, lr8x


class Layer2ForLRBranch:
    """Pallas port of layer2_for_LR_Branch (training-mode BatchNorm stats)."""

    def __init__(self, in_channels, out_channels, key, mm_dtype=jnp.float32):
        k1, k2, k3, k4 = jax.random.split(key, 4)
        fan1 = in_channels * 9
        fan2 = out_channels * 9
        self.w1 = jax.random.normal(
            k1, (out_channels, in_channels, 3, 3), jnp.float32) / jnp.sqrt(fan1)
        self.b1 = 0.1 * jax.random.normal(k2, (out_channels,), jnp.float32)
        self.w2 = jax.random.normal(
            k3, (1, out_channels, 3, 3), jnp.float32) / jnp.sqrt(fan2)
        self.b2 = 0.1 * jax.random.normal(k4, (1,), jnp.float32)
        self.out_channels = out_channels
        self.bn_c = out_channels // 2
        # BatchNorm affine parameters (weight=1, bias=0 at init, like PyTorch).
        self.bn_gamma = jnp.ones((self.bn_c,), jnp.float32)
        self.bn_beta = jnp.zeros((self.bn_c,), jnp.float32)
        # Set to jnp.bfloat16 on v6e/v7x for 2x MXU throughput (loosens tol).
        self.mm_dtype = mm_dtype

    def params(self):
        return dict(w1=self.w1, b1=self.b1, w2=self.w2, b2=self.b2,
                    bn_gamma=self.bn_gamma, bn_beta=self.bn_beta)

    def __call__(self, x_nchw, inference):
        return layer2_forward(self.params(), x_nchw,
                              inference=bool(inference), bn_c=self.bn_c,
                              mm_dtype=self.mm_dtype)


# --------------------------- pure-JAX reference -----------------------------

def _reference(x_nchw, mod):
    dn = ("NCHW", "OIHW", "NCHW")
    y = jax.lax.conv_general_dilated(
        x_nchw, mod.w1, (1, 1), ((1, 1), (1, 1)), dimension_numbers=dn)
    y = y + mod.b1[None, :, None, None]
    bn_c = mod.bn_c
    xb, xi = y[:, :bn_c], y[:, bn_c:]
    bm = xb.mean(axis=(0, 2, 3), keepdims=True)
    bv = ((xb - bm) ** 2).mean(axis=(0, 2, 3), keepdims=True)
    yb = (xb - bm) / jnp.sqrt(bv + 1e-5)
    im = xi.mean(axis=(2, 3), keepdims=True)
    iv = ((xi - im) ** 2).mean(axis=(2, 3), keepdims=True)
    yi = (xi - im) / jnp.sqrt(iv + 1e-5)
    lr8x = jnp.maximum(jnp.concatenate([yb, yi], axis=1), 0.0)
    y2 = jax.lax.conv_general_dilated(
        lr8x, mod.w2, (2, 2), ((1, 1), (1, 1)), dimension_numbers=dn)
    y2 = y2 + mod.b2[None, :, None, None]
    return jax.nn.sigmoid(y2), lr8x


# --------------------------------- main -------------------------------------

if __name__ == "__main__":
    key = jax.random.PRNGKey(0)
    kx, kp = jax.random.split(key)

    in_channels, out_channels = 4, 8
    x = jax.random.normal(kx, (2, in_channels, 16, 16), jnp.float32)  # NCHW

    model = Layer2ForLRBranch(in_channels, out_channels, kp)

    # training path: conv1 -> IBNorm -> ReLU, conv2 -> sigmoid
    pred_semantic, lr8x = model(x, inference=False)
    pred_semantic = jax.block_until_ready(pred_semantic)
    lr8x = jax.block_until_ready(lr8x)

    ref_pred, ref_lr8x = _reference(x, model)
    assert pred_semantic.shape == (2, 1, 8, 8)
    assert lr8x.shape == (2, out_channels, 16, 16)
    assert jnp.allclose(pred_semantic, ref_pred, atol=2e-4, rtol=2e-4)
    assert jnp.allclose(lr8x, ref_lr8x, atol=2e-4, rtol=2e-4)

    # inference path: conv2 skipped, pred_semantic is empty
    pred_inf, lr8x_inf = model(x, inference=True)
    lr8x_inf = jax.block_until_ready(lr8x_inf)
    assert pred_inf.shape == (0,)
    assert jnp.allclose(lr8x_inf, ref_lr8x, atol=2e-4, rtol=2e-4)

    print("KERNEL_OK")
</pallas_src>

<mosaic_0001>
module attributes {stable_mosaic.version = 11 : i64} {
  func.func @_fused_kernel(%arg0: i32, %arg1: memref<2x4x256xf32, #tpu.memory_space<vmem>>, %arg2: memref<8x72xf32, #tpu.memory_space<vmem>>, %arg3: memref<8x1xf32, #tpu.memory_space<vmem>>, %arg4: memref<2x1x256xf32, #tpu.memory_space<vmem>>, %arg5: memref<8x1xf32, #tpu.memory_space<vmem>>, %arg6: memref<8x1xf32, #tpu.memory_space<vmem>>, %arg7: memref<9x8x1xf32, #tpu.memory_space<vmem>>, %arg8: memref<1x1xf32, #tpu.memory_space<vmem>>, %arg9: memref<2x8x256xf32, #tpu.memory_space<vmem>>, %arg10: memref<2x1x256xf32, #tpu.memory_space<vmem>>, %arg11: memref<72x512xf32, #tpu.memory_space<vmem>>) attributes {dimension_semantics = [#tpu.dimension_semantics<arbitrary>], iteration_bounds = array<i64: 1>, scalar_prefetch = 0 : i64, scratch_operands = 1 : i64, tpu.core_type = #tpu.core_type<tc>, window_params = [{pipeline_mode = #tpu.pipeline_mode<synchronous>, transform_indices = @transform_0, window_bounds = array<i64: 2, 4, 256>}, {pipeline_mode = #tpu.pipeline_mode<synchronous>, transform_indices = @transform_1, window_bounds = array<i64: 8, 72>}, {pipeline_mode = #tpu.pipeline_mode<synchronous>, transform_indices = @transform_2, window_bounds = array<i64: 8, 1>}, {pipeline_mode = #tpu.pipeline_mode<synchronous>, transform_indices = @transform_3, window_bounds = array<i64: 2, 1, 256>}, {pipeline_mode = #tpu.pipeline_mode<synchronous>, transform_indices = @transform_4, window_bounds = array<i64: 8, 1>}, {pipeline_mode = #tpu.pipeline_mode<synchronous>, transform_indices = @transform_5, window_bounds = array<i64: 8, 1>}, {pipeline_mode = #tpu.pipeline_mode<synchronous>, transform_indices = @transform_6, window_bounds = array<i64: 9, 8, 1>}, {pipeline_mode = #tpu.pipeline_mode<synchronous>, transform_indices = @transform_7, window_bounds = array<i64: 1, 1>}, {pipeline_mode = #tpu.pipeline_mode<synchronous>, transform_indices = @transform_8, window_bounds = array<i64: 2, 8, 256>}, {pipeline_mode = #tpu.pipeline_mode<synchronous>, transform_indices = @transform_9, window_bounds = array<i64: 2, 1, 256>}]} {
    %c0 = arith.constant 0 : index
    %c0_0 = arith.constant 0 : index
    %c0_1 = arith.constant 0 : index
    %0 = vector.load %arg4[%c0, %c0_0, %c0_1] : memref<2x1x256xf32, #tpu.memory_space<vmem>>, vector<1x1x256xf32>
    %1 = vector.shape_cast %0 : vector<1x1x256xf32> to vector<1x256xf32>
    %c1 = arith.constant 1 : index
    %c0_2 = arith.constant 0 : index
    %c0_3 = arith.constant 0 : index
    %2 = vector.load %arg4[%c1, %c0_2, %c0_3] : memref<2x1x256xf32, #tpu.memory_space<vmem>>, vector<1x1x256xf32>
    %3 = vector.shape_cast %2 : vector<1x1x256xf32> to vector<1x256xf32>
    %cst = arith.constant 0.000000e+00 : f32
    %4 = vector.broadcast %cst : f32 to vector<72x512xf32>
    %c0_4 = arith.constant 0 : index
    %c0_5 = arith.constant 0 : index
    %5 = vector.load %arg11[%c0_4, %c0_5] : memref<72x512xf32, #tpu.memory_space<vmem>>, vector<72x512xf32>
    tpu.vector_store %arg11[%c0_4, %c0_5], %4 {strides = array<i32>} : memref<72x512xf32, #tpu.memory_space<vmem>>, vector<72x512xf32>,
    %c0_6 = arith.constant 0 : index
    %c0_7 = arith.constant 0 : index
    %c0_8 = arith.constant 0 : index
    %6 = vector.load %arg1[%c0_6, %c0_7, %c0_8] : memref<2x4x256xf32, #tpu.memory_space<vmem>>, vector<1x4x256xf32>
    %7 = vector.shape_cast %6 : vector<1x4x256xf32> to vector<4x256xf32>
    %cst_9 = arith.constant 0.000000e+00 : f32
    %8 = vector.broadcast %cst_9 : f32 to vector<4x17xf32>
    %9 = tpu.concatenate %8, %7, %8 in 1 : vector<4x17xf32>, vector<4x256xf32>, vector<4x17xf32> -> vector<4x290xf32>
    %10 = vector.extract_strided_slice %9 {offsets = [0, 0], sizes = [4, 256], strides = [1, 1]} : vector<4x290xf32> to vector<4x256xf32>
    %11 = vector.broadcast %1 : vector<1x256xf32> to vector<4x256xf32>
    %12 = arith.mulf %10, %11 : vector<4x256xf32>
    %c0_10 = arith.constant 0 : index
    %c0_11 = arith.constant 0 : index
    %13 = vector.load %arg11[%c0_10, %c0_11] : memref<72x512xf32, #tpu.memory_space<vmem>>, vector<4x256xf32>
    tpu.vector_store %arg11[%c0_10, %c0_11], %12 {strides = array<i32>} : memref<72x512xf32, #tpu.memory_space<vmem>>, vector<4x256xf32>,
    %14 = vector.extract_strided_slice %9 {offsets = [0, 1], sizes = [4, 256], strides = [1, 1]} : vector<4x290xf32> to vector<4x256xf32>
    %c8 = arith.constant 8 : index
    %c0_12 = arith.constant 0 : index
    %15 = vector.load %arg11[%c8, %c0_12] : memref<72x512xf32, #tpu.memory_space<vmem>>, vector<4x256xf32>
    tpu.vector_store %arg11[%c8, %c0_12], %14 {strides = array<i32>} : memref<72x512xf32, #tpu.memory_space<vmem>>, vector<4x256xf32>,
    %16 = vector.extract_strided_slice %9 {offsets = [0, 2], sizes = [4, 256], strides = [1, 1]} : vector<4x290xf32> to vector<4x256xf32>
    %17 = vector.broadcast %3 : vector<1x256xf32> to vector<4x256xf32>
    %18 = arith.mulf %16, %17 : vector<4x256xf32>
    %c16 = arith.constant 16 : index
    %c0_13 = arith.constant 0 : index
    %19 = vector.load %arg11[%c16, %c0_13] : memref<72x512xf32, #tpu.memory_space<vmem>>, vector<4x256xf32>
    tpu.vector_store %arg11[%c16, %c0_13], %18 {strides = array<i32>} : memref<72x512xf32, #tpu.memory_space<vmem>>, vector<4x256xf32>,
    %20 = vector.extract_strided_slice %9 {offsets = [0, 16], sizes = [4, 256], strides = [1, 1]} : vector<4x290xf32> to vector<4x256xf32>
    %21 = vector.broadcast %1 : vector<1x256xf32> to vector<4x256xf32>
    %22 = arith.mulf %20, %21 : vector<4x256xf32>
    %c24 = arith.constant 24 : index
    %c0_14 = arith.constant 0 : index
    %23 = vector.load %arg11[%c24, %c0_14] : memref<72x512xf32, #tpu.memory_space<vmem>>, vector<4x256xf32>
    tpu.vector_store %arg11[%c24, %c0_14], %22 {strides = array<i32>} : memref<72x512xf32, #tpu.memory_space<vmem>>, vector<4x256xf32>,
    %24 = vector.extract_strided_slice %9 {offsets = [0, 17], sizes = [4, 256], strides = [1, 1]} : vector<4x290xf32> to vector<4x256xf32>
    %c32 = arith.constant 32 : index
    %c0_15 = arith.constant 0 : index
    %25 = vector.load %arg11[%c32, %c0_15] : memref<72x512xf32, #tpu.memory_space<vmem>>, vector<4x256xf32>
    tpu.vector_store %arg11[%c32, %c0_15], %24 {strides = array<i32>} : memref<72x512xf32, #tpu.memory_space<vmem>>, vector<4x256xf32>,
    %26 = vector.extract_strided_slice %9 {offsets = [0, 18], sizes = [4, 256], strides = [1, 1]} : vector<4x290xf32> to vector<4x256xf32>
    %27 = vector.broadcast %3 : vector<1x256xf32> to vector<4x256xf32>
    %28 = arith.mulf %26, %27 : vector<4x256xf32>
    %c40 = arith.constant 40 : index
    %c0_16 = arith.constant 0 : index
    %29 = vector.load %arg11[%c40, %c0_16] : memref<72x512xf32, #tpu.memory_space<vmem>>, vector<4x256xf32>
    tpu.vector_store %arg11[%c40, %c0_16], %28 {strides = array<i32>} : memref<72x512xf32, #tpu.memory_space<vmem>>, vector<4x256xf32>,
    %30 = vector.extract_strided_slice %9 {offsets = [0, 32], sizes = [4, 256], strides = [1, 1]} : vector<4x290xf32> to vector<4x256xf32>
    %31 = vector.broadcast %1 : vector<1x256xf32> to vector<4x256xf32>
    %32 = arith.mulf %30, %31 : vector<4x256xf32>
    %c48 = arith.constant 48 : index
    %c0_17 = arith.constant 0 : index
    %33 = vector.load %arg11[%c48, %c0_17] : memref<72x512xf32, #tpu.memory_space<vmem>>, vector<4x256xf32>
    tpu.vector_store %arg11[%c48, %c0_17], %32 {strides = array<i32>} : memref<72x512xf32, #tpu.memory_space<vmem>>, vector<4x256xf32>,
    %34 = vector.extract_strided_slice %9 {offsets = [0, 33], sizes = [4, 256], strides = [1, 1]} : vector<4x290xf32> to vector<4x256xf32>
    %c56 = arith.constant 56 : index
    %c0_18 = arith.constant 0 : index
    %35 = vector.load %arg11[%c56, %c0_18] : memref<72x512xf32, #tpu.memory_space<vmem>>, vector<4x256xf32>
    tpu.vector_store %arg11[%c56, %c0_18], %34 {strides = array<i32>} : memref<72x512xf32, #tpu.memory_space<vmem>>, vector<4x256xf32>,
    %36 = vector.extract_strided_slice %9 {offsets = [0, 34], sizes = [4, 256], strides = [1, 1]} : vector<4x290xf32> to vector<4x256xf32>
    %37 = vector.broadcast %3 : vector<1x256xf32> to vector<4x256xf32>
    %38 = arith.mulf %36, %37 : vector<4x256xf32>
    %c64 = arith.constant 64 : index
    %c0_19 = arith.constant 0 : index
    %39 = vector.load %arg11[%c64, %c0_19] : memref<72x512xf32, #tpu.memory_space<vmem>>, vector<4x256xf32>
    tpu.vector_store %arg11[%c64, %c0_19], %38 {strides = array<i32>} : memref<72x512xf32, #tpu.memory_space<vmem>>, vector<4x256xf32>,
    %c1_20 = arith.constant 1 : index
    %c0_21 = arith.constant 0 : index
    %c0_22 = arith.constant 0 : index
    %40 = vector.load %arg1[%c1_20, %c0_21, %c0_22] : memref<2x4x256xf32, #tpu.memory_space<vmem>>, vector<1x4x256xf32>
    %41 = vector.shape_cast %40 : vector<1x4x256xf32> to vector<4x256xf32>
    %cst_23 = arith.constant 0.000000e+00 : f32
    %42 = vector.broadcast %cst_23 : f32 to vector<4x17xf32>
    %43 = tpu.concatenate %42, %41, %42 in 1 : vector<4x17xf32>, vector<4x256xf32>, vector<4x17xf32> -> vector<4x290xf32>
    %44 = vector.extract_strided_slice %43 {offsets = [0, 0], sizes = [4, 256], strides = [1, 1]} : vector<4x290xf32> to vector<4x256xf32>
    %45 = vector.broadcast %1 : vector<1x256xf32> to vector<4x256xf32>
    %46 = arith.mulf %44, %45 : vector<4x256xf32>
    %c0_24 = arith.constant 0 : index
    %c256 = arith.constant 256 : index
    %47 = vector.load %arg11[%c0_24, %c256] : memref<72x512xf32, #tpu.memory_space<vmem>>, vector<4x256xf32>
    tpu.vector_store %arg11[%c0_24, %c256], %46 {strides = array<i32>} : memref<72x512xf32, #tpu.memory_space<vmem>>, vector<4x256xf32>,
    %48 = vector.extract_strided_slice %43 {offsets = [0, 1], sizes = [4, 256], strides = [1, 1]} : vector<4x290xf32> to vector<4x256xf32>
    %c8_25 = arith.constant 8 : index
    %c256_26 = arith.constant 256 : index
    %49 = vector.load %arg11[%c8_25, %c256_26] : memref<72x512xf32, #tpu.memory_space<vmem>>, vector<4x256xf32>
    tpu.vector_store %arg11[%c8_25, %c256_26], %48 {strides = array<i32>} : memref<72x512xf32, #tpu.memory_space<vmem>>, vector<4x256xf32>,
    %50 = vector.extract_strided_slice %43 {offsets = [0, 2], sizes = [4, 256], strides = [1, 1]} : vector<4x290xf32> to vector<4x256xf32>
    %51 = vector.broadcast %3 : vector<1x256xf32> to vector<4x256xf32>
    %52 = arith.mulf %50, %51 : vector<4x256xf32>
    %c16_27 = arith.constant 16 : index
    %c256_28 = arith.constant 256 : index
    %53 = vector.load %arg11[%c16_27, %c256_28] : memref<72x512xf32, #tpu.memory_space<vmem>>, vector<4x256xf32>
    tpu.vector_store %arg11[%c16_27, %c256_28], %52 {strides = array<i32>} : memref<72x512xf32, #tpu.memory_space<vmem>>, vector<4x256xf32>,
    %54 = vector.extract_strided_slice %43 {offsets = [0, 16], sizes = [4, 256], strides = [1, 1]} : vector<4x290xf32> to vector<4x256xf32>
    %55 = vector.broadcast %1 : vector<1x256xf32> to vector<4x256xf32>
    %56 = arith.mulf %54, %55 : vector<4x256xf32>
    %c24_29 = arith.constant 24 : index
    %c256_30 = arith.constant 256 : index
    %57 = vector.load %arg11[%c24_29, %c256_30] : memref<72x512xf32, #tpu.memory_space<vmem>>, vector<4x256xf32>
    tpu.vector_store %arg11[%c24_29, %c256_30], %56 {strides = array<i32>} : memref<72x512xf32, #tpu.memory_space<vmem>>, vector<4x256xf32>,
    %58 = vector.extract_strided_slice %43 {offsets = [0, 17], sizes = [4, 256], strides = [1, 1]} : vector<4x290xf32> to vector<4x256xf32>
    %c32_31 = arith.constant 32 : index
    %c256_32 = arith.constant 256 : index
    %59 = vector.load %arg11[%c32_31, %c256_32] : memref<72x512xf32, #tpu.memory_space<vmem>>, vector<4x256xf32>
    tpu.vector_store %arg11[%c32_31, %c256_32], %58 {strides = array<i32>} : memref<72x512xf32, #tpu.memory_space<vmem>>, vector<4x256xf32>,
    %60 = vector.extract_strided_slice %43 {offsets = [0, 18], sizes = [4, 256], strides = [1, 1]} : vector<4x290xf32> to vector<4x256xf32>
    %61 = vector.broadcast %3 : vector<1x256xf32> to vector<4x256xf32>
    %62 = arith.mulf %60, %61 : vector<4x256xf32>
    %c40_33 = arith.constant 40 : index
    %c256_34 = arith.constant 256 : index
    %63 = vector.load %arg11[%c40_33, %c256_34] : memref<72x512xf32, #tpu.memory_space<vmem>>, vector<4x256xf32>
    tpu.vector_store %arg11[%c40_33, %c256_34], %62 {strides = array<i32>} : memref<72x512xf32, #tpu.memory_space<vmem>>, vector<4x256xf32>,
    %64 = vector.extract_strided_slice %43 {offsets = [0, 32], sizes = [4, 256], strides = [1, 1]} : vector<4x290xf32> to vector<4x256xf32>
    %65 = vector.broadcast %1 : vector<1x256xf32> to vector<4x256xf32>
    %66 = arith.mulf %64, %65 : vector<4x256xf32>
    %c48_35 = arith.constant 48 : index
    %c256_36 = arith.constant 256 : index
    %67 = vector.load %arg11[%c48_35, %c256_36] : memref<72x512xf32, #tpu.memory_space<vmem>>, vector<4x256xf32>
    tpu.vector_store %arg11[%c48_35, %c256_36], %66 {strides = array<i32>} : memref<72x512xf32, #tpu.memory_space<vmem>>, vector<4x256xf32>,
    %68 = vector.extract_strided_slice %43 {offsets = [0, 33], sizes = [4, 256], strides = [1, 1]} : vector<4x290xf32> to vector<4x256xf32>
    %c56_37 = arith.constant 56 : index
    %c256_38 = arith.constant 256 : index
    %69 = vector.load %arg11[%c56_37, %c256_38] : memref<72x512xf32, #tpu.memory_space<vmem>>, vector<4x256xf32>
    tpu.vector_store %arg11[%c56_37, %c256_38], %68 {strides = array<i32>} : memref<72x512xf32, #tpu.memory_space<vmem>>, vector<4x256xf32>,
    %70 = vector.extract_strided_slice %43 {offsets = [0, 34], sizes = [4, 256], strides = [1, 1]} : vector<4x290xf32> to vector<4x256xf32>
    %71 = vector.broadcast %3 : vector<1x256xf32> to vector<4x256xf32>
    %72 = arith.mulf %70, %71 : vector<4x256xf32>
    %c64_39 = arith.constant 64 : index
    %c256_40 = arith.constant 256 : index
    %73 = vector.load %arg11[%c64_39, %c256_40] : memref<72x512xf32, #tpu.memory_space<vmem>>, vector<4x256xf32>
    tpu.vector_store %arg11[%c64_39, %c256_40], %72 {strides = array<i32>} : memref<72x512xf32, #tpu.memory_space<vmem>>, vector<4x256xf32>,
    %c0_41 = arith.constant 0 : index
    %c0_42 = arith.constant 0 : index
    %74 = vector.load %arg2[%c0_41, %c0_42] : memref<8x72xf32, #tpu.memory_space<vmem>>, vector<8x72xf32>
    %c0_43 = arith.constant 0 : index
    %c0_44 = arith.constant 0 : index
    %75 = vector.load %arg11[%c0_43, %c0_44] : memref<72x512xf32, #tpu.memory_space<vmem>>, vector<72x512xf32>
    %cst_45 = arith.constant dense<0.000000e+00> : vector<8x512xf32>
    %76 = tpu.matmul %74, %75, %cst_45 {dimension_numbers = #tpu.dot_dimension_numbers<[1], [0], [0], [1], [0, 0, 1, 1], [], []>} : vector<8x72xf32>, vector<72x512xf32>, vector<8x512xf32> -> vector<8x512xf32>
    %c0_46 = arith.constant 0 : index
    %c0_47 = arith.constant 0 : index
    %77 = vector.load %arg3[%c0_46, %c0_47] : memref<8x1xf32, #tpu.memory_space<vmem>>, vector<8x1xf32>
    %78 = vector.broadcast %77 : vector<8x1xf32> to vector<8x512xf32>
    %79 = arith.addf %76, %78 : vector<8x512xf32>
    %80 = vector.extract_strided_slice %79 {offsets = [0, 0], sizes = [8, 256], strides = [1, 1]} : vector<8x512xf32> to vector<8x256xf32>
    %cst_48 = arith.constant dense<0.000000e+00> : vector<8xf32>
    %81 = vector.multi_reduction <add>, %80, %cst_48 [1] : vector<8x256xf32> to vector<8xf32>
    %82 = vector.shape_cast %81 : vector<8xf32> to vector<8x1xf32>
    %83 = arith.mulf %80, %80 : vector<8x256xf32>
    %cst_49 = arith.constant dense<0.000000e+00> : vector<8xf32>
    %84 = vector.multi_reduction <add>, %83, %cst_49 [1] : vector<8x256xf32> to vector<8xf32>
    %85 = vector.shape_cast %84 : vector<8xf32> to vector<8x1xf32>
    %86 = vector.extract_strided_slice %79 {offsets = [0, 256], sizes = [8, 256], strides = [1, 1]} : vector<8x512xf32> to vector<8x256xf32>
    %cst_50 = arith.constant dense<0.000000e+00> : vector<8xf32>
    %87 = vector.multi_reduction <add>, %86, %cst_50 [1] : vector<8x256xf32> to vector<8xf32>
    %88 = vector.shape_cast %87 : vector<8xf32> to vector<8x1xf32>
    %89 = arith.mulf %86, %86 : vector<8x256xf32>
    %cst_51 = arith.constant dense<0.000000e+00> : vector<8xf32>
    %90 = vector.multi_reduction <add>, %89, %cst_51 [1] : vector<8x256xf32> to vector<8xf32>
    %91 = vector.shape_cast %90 : vector<8xf32> to vector<8x1xf32>
    %92 = arith.addf %82, %88 : vector<8x1xf32>
    %93 = arith.addf %85, %91 : vector<8x1xf32>
    %cst_52 = arith.constant 0.001953125 : f32
    %94 = vector.broadcast %cst_52 : f32 to vector<8x1xf32>
    %95 = arith.mulf %92, %94 : vector<8x1xf32>
    %cst_53 = arith.constant 0.001953125 : f32
    %96 = vector.broadcast %cst_53 : f32 to vector<8x1xf32>
    %97 = arith.mulf %93, %96 : vector<8x1xf32>
    %98 = arith.mulf %95, %95 : vector<8x1xf32>
    %99 = arith.subf %97, %98 : vector<8x1xf32>
    %100 = tpu.iota {dimensions = array<i32: 0>} : vector<8x1xi32>
    %c4_i32 = arith.constant 4 : i32
    %101 = vector.broadcast %c4_i32 : i32 to vector<8x1xi32>
    %102 = arith.cmpi slt, %100, %101 : vector<8x1xi32>
    %c0_54 = arith.constant 0 : index
    %c0_55 = arith.constant 0 : index
    %103 = vector.load %arg5[%c0_54, %c0_55] : memref<8x1xf32, #tpu.memory_space<vmem>>, vector<8x1xf32>
    %c0_56 = arith.constant 0 : index
    %c0_57 = arith.constant 0 : index
    %104 = vector.load %arg6[%c0_56, %c0_57] : memref<8x1xf32, #tpu.memory_space<vmem>>, vector<8x1xf32>
    %cst_58 = arith.constant 3.906250e-03 : f32
    %105 = vector.broadcast %cst_58 : f32 to vector<8x1xf32>
    %106 = arith.mulf %82, %105 : vector<8x1xf32>
    %cst_59 = arith.constant 3.906250e-03 : f32
    %107 = vector.broadcast %cst_59 : f32 to vector<8x1xf32>
    %108 = arith.mulf %85, %107 : vector<8x1xf32>
    %109 = arith.mulf %106, %106 : vector<8x1xf32>
    %110 = arith.subf %108, %109 : vector<8x1xf32>
    %111 = arith.select %102, %95, %106 : vector<8x1xi1>, vector<8x1xf32>
    %112 = arith.select %102, %99, %110 : vector<8x1xi1>, vector<8x1xf32>
    %cst_60 = arith.constant 9.99999974E-6 : f32
    %113 = vector.broadcast %cst_60 : f32 to vector<8x1xf32>
    %114 = arith.addf %112, %113 : vector<8x1xf32>
    %115 = math.rsqrt %114 : vector<8x1xf32>
    %116 = arith.mulf %103, %115 : vector<8x1xf32>
    %117 = arith.mulf %111, %116 : vector<8x1xf32>
    %118 = arith.subf %104, %117 : vector<8x1xf32>
    %119 = vector.extract_strided_slice %79 {offsets = [0, 0], sizes = [8, 256], strides = [1, 1]} : vector<8x512xf32> to vector<8x256xf32>
    %120 = vector.broadcast %116 : vector<8x1xf32> to vector<8x256xf32>
    %121 = arith.mulf %119, %120 : vector<8x256xf32>
    %122 = vector.broadcast %118 : vector<8x1xf32> to vector<8x256xf32>
    %123 = arith.addf %121, %122 : vector<8x256xf32>
    %cst_61 = arith.constant 0.000000e+00 : f32
    %124 = vector.broadcast %cst_61 : f32 to vector<8x256xf32>
    %125 = arith.maximumf %123, %124 : vector<8x256xf32>
    %c0_62 = arith.constant 0 : index
    %c0_63 = arith.constant 0 : index
    %c0_64 = arith.constant 0 : index
    %126 = vector.load %arg9[%c0_62, %c0_63, %c0_64] : memref<2x8x256xf32, #tpu.memory_space<vmem>>, vector<1x8x256xf32>
    %127 = vector.shape_cast %126 : vector<1x8x256xf32> to vector<8x256xf32>
    %128 = vector.shape_cast %125 : vector<8x256xf32> to vector<1x8x256xf32>
    tpu.vector_store %arg9[%c0_62, %c0_63, %c0_64], %128 {strides = array<i32>} : memref<2x8x256xf32, #tpu.memory_space<vmem>>, vector<1x8x256xf32>,
    %cst_65 = arith.constant 0.000000e+00 : f32
    %129 = vector.broadcast %cst_65 : f32 to vector<8x17xf32>
    %130 = tpu.concatenate %129, %125, %129 in 1 : vector<8x17xf32>, vector<8x256xf32>, vector<8x17xf32> -> vector<8x290xf32>
    %cst_66 = arith.constant 0.000000e+00 : f32
    %131 = vector.broadcast %cst_66 : f32 to vector<8x256xf32>
    %132 = vector.extract_strided_slice %130 {offsets = [0, 0], sizes = [8, 256], strides = [1, 1]} : vector<8x290xf32> to vector<8x256xf32>
    %133 = vector.broadcast %1 : vector<1x256xf32> to vector<8x256xf32>
    %134 = arith.mulf %132, %133 : vector<8x256xf32>
    %c0_67 = arith.constant 0 : index
    %c0_68 = arith.constant 0 : index
    %c0_69 = arith.constant 0 : index
    %135 = vector.load %arg7[%c0_67, %c0_68, %c0_69] : memref<9x8x1xf32, #tpu.memory_space<vmem>>, vector<1x8x1xf32>
    %136 = vector.shape_cast %135 : vector<1x8x1xf32> to vector<8x1xf32>
    %137 = vector.broadcast %136 : vector<8x1xf32> to vector<8x256xf32>
    %138 = arith.mulf %134, %137 : vector<8x256xf32>
    %139 = arith.addf %131, %138 : vector<8x256xf32>
    %140 = vector.extract_strided_slice %130 {offsets = [0, 1], sizes = [8, 256], strides = [1, 1]} : vector<8x290xf32> to vector<8x256xf32>
    %c1_70 = arith.constant 1 : index
    %c0_71 = arith.constant 0 : index
    %c0_72 = arith.constant 0 : index
    %141 = vector.load %arg7[%c1_70, %c0_71, %c0_72] : memref<9x8x1xf32, #tpu.memory_space<vmem>>, vector<1x8x1xf32>
    %142 = vector.shape_cast %141 : vector<1x8x1xf32> to vector<8x1xf32>
    %143 = vector.broadcast %142 : vector<8x1xf32> to vector<8x256xf32>
    %144 = arith.mulf %140, %143 : vector<8x256xf32>
    %145 = arith.addf %139, %144 : vector<8x256xf32>
    %146 = vector.extract_strided_slice %130 {offsets = [0, 2], sizes = [8, 256], strides = [1, 1]} : vector<8x290xf32> to vector<8x256xf32>
    %147 = vector.broadcast %3 : vector<1x256xf32> to vector<8x256xf32>
    %148 = arith.mulf %146, %147 : vector<8x256xf32>
    %c2 = arith.constant 2 : index
    %c0_73 = arith.constant 0 : index
    %c0_74 = arith.constant 0 : index
    %149 = vector.load %arg7[%c2, %c0_73, %c0_74] : memref<9x8x1xf32, #tpu.memory_space<vmem>>, vector<1x8x1xf32>
    %150 = vector.shape_cast %149 : vector<1x8x1xf32> to vector<8x1xf32>
    %151 = vector.broadcast %150 : vector<8x1xf32> to vector<8x256xf32>
    %152 = arith.mulf %148, %151 : vector<8x256xf32>
    %153 = arith.addf %145, %152 : vector<8x256xf32>
    %154 = vector.extract_strided_slice %130 {offsets = [0, 16], sizes = [8, 256], strides = [1, 1]} : vector<8x290xf32> to vector<8x256xf32>
    %155 = vector.broadcast %1 : vector<1x256xf32> to vector<8x256xf32>
    %156 = arith.mulf %154, %155 : vector<8x256xf32>
    %c3 = arith.constant 3 : index
    %c0_75 = arith.constant 0 : index
    %c0_76 = arith.constant 0 : index
    %157 = vector.load %arg7[%c3, %c0_75, %c0_76] : memref<9x8x1xf32, #tpu.memory_space<vmem>>, vector<1x8x1xf32>
    %158 = vector.shape_cast %157 : vector<1x8x1xf32> to vector<8x1xf32>
    %159 = vector.broadcast %158 : vector<8x1xf32> to vector<8x256xf32>
    %160 = arith.mulf %156, %159 : vector<8x256xf32>
    %161 = arith.addf %153, %160 : vector<8x256xf32>
    %162 = vector.extract_strided_slice %130 {offsets = [0, 17], sizes = [8, 256], strides = [1, 1]} : vector<8x290xf32> to vector<8x256xf32>
    %c4 = arith.constant 4 : index
    %c0_77 = arith.constant 0 : index
    %c0_78 = arith.constant 0 : index
    %163 = vector.load %arg7[%c4, %c0_77, %c0_78] : memref<9x8x1xf32, #tpu.memory_space<vmem>>, vector<1x8x1xf32>
    %164 = vector.shape_cast %163 : vector<1x8x1xf32> to vector<8x1xf32>
    %165 = vector.broadcast %164 : vector<8x1xf32> to vector<8x256xf32>
    %166 = arith.mulf %162, %165 : vector<8x256xf32>
    %167 = arith.addf %161, %166 : vector<8x256xf32>
    %168 = vector.extract_strided_slice %130 {offsets = [0, 18], sizes = [8, 256], strides = [1, 1]} : vector<8x290xf32> to vector<8x256xf32>
    %169 = vector.broadcast %3 : vector<1x256xf32> to vector<8x256xf32>
    %170 = arith.mulf %168, %169 : vector<8x256xf32>
    %c5 = arith.constant 5 : index
    %c0_79 = arith.constant 0 : index
    %c0_80 = arith.constant 0 : index
    %171 = vector.load %arg7[%c5, %c0_79, %c0_80] : memref<9x8x1xf32, #tpu.memory_space<vmem>>, vector<1x8x1xf32>
    %172 = vector.shape_cast %171 : vector<1x8x1xf32> to vector<8x1xf32>
    %173 = vector.broadcast %172 : vector<8x1xf32> to vector<8x256xf32>
    %174 = arith.mulf %170, %173 : vector<8x256xf32>
    %175 = arith.addf %167, %174 : vector<8x256xf32>
    %176 = vector.extract_strided_slice %130 {offsets = [0, 32], sizes = [8, 256], strides = [1, 1]} : vector<8x290xf32> to vector<8x256xf32>
    %177 = vector.broadcast %1 : vector<1x256xf32> to vector<8x256xf32>
    %178 = arith.mulf %176, %177 : vector<8x256xf32>
    %c6 = arith.constant 6 : index
    %c0_81 = arith.constant 0 : index
    %c0_82 = arith.constant 0 : index
    %179 = vector.load %arg7[%c6, %c0_81, %c0_82] : memref<9x8x1xf32, #tpu.memory_space<vmem>>, vector<1x8x1xf32>
    %180 = vector.shape_cast %179 : vector<1x8x1xf32> to vector<8x1xf32>
    %181 = vector.broadcast %180 : vector<8x1xf32> to vector<8x256xf32>
    %182 = arith.mulf %178, %181 : vector<8x256xf32>
    %183 = arith.addf %175, %182 : vector<8x256xf32>
    %184 = vector.extract_strided_slice %130 {offsets = [0, 33], sizes = [8, 256], strides = [1, 1]} : vector<8x290xf32> to vector<8x256xf32>
    %c7 = arith.constant 7 : index
    %c0_83 = arith.constant 0 : index
    %c0_84 = arith.constant 0 : index
    %185 = vector.load %arg7[%c7, %c0_83, %c0_84] : memref<9x8x1xf32, #tpu.memory_space<vmem>>, vector<1x8x1xf32>
    %186 = vector.shape_cast %185 : vector<1x8x1xf32> to vector<8x1xf32>
    %187 = vector.broadcast %186 : vector<8x1xf32> to vector<8x256xf32>
    %188 = arith.mulf %184, %187 : vector<8x256xf32>
    %189 = arith.addf %183, %188 : vector<8x256xf32>
    %190 = vector.extract_strided_slice %130 {offsets = [0, 34], sizes = [8, 256], strides = [1, 1]} : vector<8x290xf32> to vector<8x256xf32>
    %191 = vector.broadcast %3 : vector<1x256xf32> to vector<8x256xf32>
    %192 = arith.mulf %190, %191 : vector<8x256xf32>
    %c8_85 = arith.constant 8 : index
    %c0_86 = arith.constant 0 : index
    %c0_87 = arith.constant 0 : index
    %193 = vector.load %arg7[%c8_85, %c0_86, %c0_87] : memref<9x8x1xf32, #tpu.memory_space<vmem>>, vector<1x8x1xf32>
    %194 = vector.shape_cast %193 : vector<1x8x1xf32> to vector<8x1xf32>
    %195 = vector.broadcast %194 : vector<8x1xf32> to vector<8x256xf32>
    %196 = arith.mulf %192, %195 : vector<8x256xf32>
    %197 = arith.addf %189, %196 : vector<8x256xf32>
    %cst_88 = arith.constant dense<0.000000e+00> : vector<256xf32>
    %198 = vector.multi_reduction <add>, %197, %cst_88 [0] : vector<8x256xf32> to vector<256xf32>
    %199 = vector.shape_cast %198 : vector<256xf32> to vector<1x256xf32>
    %c0_89 = arith.constant 0 : index
    %c0_90 = arith.constant 0 : index
    %200 = vector.load %arg8[%c0_89, %c0_90] : memref<1x1xf32, #tpu.memory_space<vmem>>, vector<1x1xf32>
    %201 = vector.broadcast %200 : vector<1x1xf32> to vector<1x256xf32>
    %202 = arith.addf %199, %201 : vector<1x256xf32>
    %203 = arith.negf %202 : vector<1x256xf32>
    %204 = math.exp %203 : vector<1x256xf32>
    %cst_91 = arith.constant 1.000000e+00 : f32
    %205 = vector.broadcast %cst_91 : f32 to vector<1x256xf32>
    %206 = arith.addf %205, %204 : vector<1x256xf32>
    %207 = arith.divf %205, %206 : vector<1x256xf32>
    %c0_92 = arith.constant 0 : index
    %c0_93 = arith.constant 0 : index
    %c0_94 = arith.constant 0 : index
    %208 = vector.load %arg10[%c0_92, %c0_93, %c0_94] : memref<2x1x256xf32, #tpu.memory_space<vmem>>, vector<1x1x256xf32>
    %209 = vector.shape_cast %208 : vector<1x1x256xf32> to vector<1x256xf32>
    %210 = vector.shape_cast %207 : vector<1x256xf32> to vector<1x1x256xf32>
    tpu.vector_store %arg10[%c0_92, %c0_93, %c0_94], %210 {strides = array<i32>} : memref<2x1x256xf32, #tpu.memory_space<vmem>>, vector<1x1x256xf32>,
    %cst_95 = arith.constant 3.906250e-03 : f32
    %211 = vector.broadcast %cst_95 : f32 to vector<8x1xf32>
    %212 = arith.mulf %88, %211 : vector<8x1xf32>
    %cst_96 = arith.constant 3.906250e-03 : f32
    %213 = vector.broadcast %cst_96 : f32 to vector<8x1xf32>
    %214 = arith.mulf %91, %213 : vector<8x1xf32>
    %215 = arith.mulf %212, %212 : vector<8x1xf32>
    %216 = arith.subf %214, %215 : vector<8x1xf32>
    %217 = arith.select %102, %95, %212 : vector<8x1xi1>, vector<8x1xf32>
    %218 = arith.select %102, %99, %216 : vector<8x1xi1>, vector<8x1xf32>
    %cst_97 = arith.constant 9.99999974E-6 : f32
    %219 = vector.broadcast %cst_97 : f32 to vector<8x1xf32>
    %220 = arith.addf %218, %219 : vector<8x1xf32>
    %221 = math.rsqrt %220 : vector<8x1xf32>
    %222 = arith.mulf %103, %221 : vector<8x1xf32>
    %223 = arith.mulf %217, %222 : vector<8x1xf32>
    %224 = arith.subf %104, %223 : vector<8x1xf32>
    %225 = vector.extract_strided_slice %79 {offsets = [0, 256], sizes = [8, 256], strides = [1, 1]} : vector<8x512xf32> to vector<8x256xf32>
    %226 = vector.broadcast %222 : vector<8x1xf32> to vector<8x256xf32>
    %227 = arith.mulf %225, %226 : vector<8x256xf32>
    %228 = vector.broadcast %224 : vector<8x1xf32> to vector<8x256xf32>
    %229 = arith.addf %227, %228 : vector<8x256xf32>
    %cst_98 = arith.constant 0.000000e+00 : f32
    %230 = vector.broadcast %cst_98 : f32 to vector<8x256xf32>
    %231 = arith.maximumf %229, %230 : vector<8x256xf32>
    %c1_99 = arith.constant 1 : index
    %c0_100 = arith.constant 0 : index
    %c0_101 = arith.constant 0 : index
    %232 = vector.load %arg9[%c1_99, %c0_100, %c0_101] : memref<2x8x256xf32, #tpu.memory_space<vmem>>, vector<1x8x256xf32>
    %233 = vector.shape_cast %232 : vector<1x8x256xf32> to vector<8x256xf32>
    %234 = vector.shape_cast %231 : vector<8x256xf32> to vector<1x8x256xf32>
    tpu.vector_store %arg9[%c1_99, %c0_100, %c0_101], %234 {strides = array<i32>} : memref<2x8x256xf32, #tpu.memory_space<vmem>>, vector<1x8x256xf32>,
    %cst_102 = arith.constant 0.000000e+00 : f32
    %235 = vector.broadcast %cst_102 : f32 to vector<8x17xf32>
    %236 = tpu.concatenate %235, %231, %235 in 1 : vector<8x17xf32>, vector<8x256xf32>, vector<8x17xf32> -> vector<8x290xf32>
    %cst_103 = arith.constant 0.000000e+00 : f32
    %237 = vector.broadcast %cst_103 : f32 to vector<8x256xf32>
    %238 = vector.extract_strided_slice %236 {offsets = [0, 0], sizes = [8, 256], strides = [1, 1]} : vector<8x290xf32> to vector<8x256xf32>
    %239 = vector.broadcast %1 : vector<1x256xf32> to vector<8x256xf32>
    %240 = arith.mulf %238, %239 : vector<8x256xf32>
    %c0_104 = arith.constant 0 : index
    %c0_105 = arith.constant 0 : index
    %c0_106 = arith.constant 0 : index
    %241 = vector.load %arg7[%c0_104, %c0_105, %c0_106] : memref<9x8x1xf32, #tpu.memory_space<vmem>>, vector<1x8x1xf32>
    %242 = vector.shape_cast %241 : vector<1x8x1xf32> to vector<8x1xf32>
    %243 = vector.broadcast %242 : vector<8x1xf32> to vector<8x256xf32>
    %244 = arith.mulf %240, %243 : vector<8x256xf32>
    %245 = arith.addf %237, %244 : vector<8x256xf32>
    %246 = vector.extract_strided_slice %236 {offsets = [0, 1], sizes = [8, 256], strides = [1, 1]} : vector<8x290xf32> to vector<8x256xf32>
    %c1_107 = arith.constant 1 : index
    %c0_108 = arith.constant 0 : index
    %c0_109 = arith.constant 0 : index
    %247 = vector.load %arg7[%c1_107, %c0_108, %c0_109] : memref<9x8x1xf32, #tpu.memory_space<vmem>>, vector<1x8x1xf32>
    %248 = vector.shape_cast %247 : vector<1x8x1xf32> to vector<8x1xf32>
    %249 = vector.broadcast %248 : vector<8x1xf32> to vector<8x256xf32>
    %250 = arith.mulf %246, %249 : vector<8x256xf32>
    %251 = arith.addf %245, %250 : vector<8x256xf32>
    %252 = vector.extract_strided_slice %236 {offsets = [0, 2], sizes = [8, 256], strides = [1, 1]} : vector<8x290xf32> to vector<8x256xf32>
    %253 = vector.broadcast %3 : vector<1x256xf32> to vector<8x256xf32>
    %254 = arith.mulf %252, %253 : vector<8x256xf32>
    %c2_110 = arith.constant 2 : index
    %c0_111 = arith.constant 0 : index
    %c0_112 = arith.constant 0 : index
    %255 = vector.load %arg7[%c2_110, %c0_111, %c0_112] : memref<9x8x1xf32, #tpu.memory_space<vmem>>, vector<1x8x1xf32>
    %256 = vector.shape_cast %255 : vector<1x8x1xf32> to vector<8x1xf32>
    %257 = vector.broadcast %256 : vector<8x1xf32> to vector<8x256xf32>
    %258 = arith.mulf %254, %257 : vector<8x256xf32>
    %259 = arith.addf %251, %258 : vector<8x256xf32>
    %260 = vector.extract_strided_slice %236 {offsets = [0, 16], sizes = [8, 256], strides = [1, 1]} : vector<8x290xf32> to vector<8x256xf32>
    %261 = vector.broadcast %1 : vector<1x256xf32> to vector<8x256xf32>
    %262 = arith.mulf %260, %261 : vector<8x256xf32>
    %c3_113 = arith.constant 3 : index
    %c0_114 = arith.constant 0 : index
    %c0_115 = arith.constant 0 : index
    %263 = vector.load %arg7[%c3_113, %c0_114, %c0_115] : memref<9x8x1xf32, #tpu.memory_space<vmem>>, vector<1x8x1xf32>
    %264 = vector.shape_cast %263 : vector<1x8x1xf32> to vector<8x1xf32>
    %265 = vector.broadcast %264 : vector<8x1xf32> to vector<8x256xf32>
    %266 = arith.mulf %262, %265 : vector<8x256xf32>
    %267 = arith.addf %259, %266 : vector<8x256xf32>
    %268 = vector.extract_strided_slice %236 {offsets = [0, 17], sizes = [8, 256], strides = [1, 1]} : vector<8x290xf32> to vector<8x256xf32>
    %c4_116 = arith.constant 4 : index
    %c0_117 = arith.constant 0 : index
    %c0_118 = arith.constant 0 : index
    %269 = vector.load %arg7[%c4_116, %c0_117, %c0_118] : memref<9x8x1xf32, #tpu.memory_space<vmem>>, vector<1x8x1xf32>
    %270 = vector.shape_cast %269 : vector<1x8x1xf32> to vector<8x1xf32>
    %271 = vector.broadcast %270 : vector<8x1xf32> to vector<8x256xf32>
    %272 = arith.mulf %268, %271 : vector<8x256xf32>
    %273 = arith.addf %267, %272 : vector<8x256xf32>
    %274 = vector.extract_strided_slice %236 {offsets = [0, 18], sizes = [8, 256], strides = [1, 1]} : vector<8x290xf32> to vector<8x256xf32>
    %275 = vector.broadcast %3 : vector<1x256xf32> to vector<8x256xf32>
    %276 = arith.mulf %274, %275 : vector<8x256xf32>
    %c5_119 = arith.constant 5 : index
    %c0_120 = arith.constant 0 : index
    %c0_121 = arith.constant 0 : index
    %277 = vector.load %arg7[%c5_119, %c0_120, %c0_121] : memref<9x8x1xf32, #tpu.memory_space<vmem>>, vector<1x8x1xf32>
    %278 = vector.shape_cast %277 : vector<1x8x1xf32> to vector<8x1xf32>
    %279 = vector.broadcast %278 : vector<8x1xf32> to vector<8x256xf32>
    %280 = arith.mulf %276, %279 : vector<8x256xf32>
    %281 = arith.addf %273, %280 : vector<8x256xf32>
    %282 = vector.extract_strided_slice %236 {offsets = [0, 32], sizes = [8, 256], strides = [1, 1]} : vector<8x290xf32> to vector<8x256xf32>
    %283 = vector.broadcast %1 : vector<1x256xf32> to vector<8x256xf32>
    %284 = arith.mulf %282, %283 : vector<8x256xf32>
    %c6_122 = arith.constant 6 : index
    %c0_123 = arith.constant 0 : index
    %c0_124 = arith.constant 0 : index
    %285 = vector.load %arg7[%c6_122, %c0_123, %c0_124] : memref<9x8x1xf32, #tpu.memory_space<vmem>>, vector<1x8x1xf32>
    %286 = vector.shape_cast %285 : vector<1x8x1xf32> to vector<8x1xf32>
    %287 = vector.broadcast %286 : vector<8x1xf32> to vector<8x256xf32>
    %288 = arith.mulf %284, %287 : vector<8x256xf32>
    %289 = arith.addf %281, %288 : vector<8x256xf32>
    %290 = vector.extract_strided_slice %236 {offsets = [0, 33], sizes = [8, 256], strides = [1, 1]} : vector<8x290xf32> to vector<8x256xf32>
    %c7_125 = arith.constant 7 : index
    %c0_126 = arith.constant 0 : index
    %c0_127 = arith.constant 0 : index
    %291 = vector.load %arg7[%c7_125, %c0_126, %c0_127] : memref<9x8x1xf32, #tpu.memory_space<vmem>>, vector<1x8x1xf32>
    %292 = vector.shape_cast %291 : vector<1x8x1xf32> to vector<8x1xf32>
    %293 = vector.broadcast %292 : vector<8x1xf32> to vector<8x256xf32>
    %294 = arith.mulf %290, %293 : vector<8x256xf32>
    %295 = arith.addf %289, %294 : vector<8x256xf32>
    %296 = vector.extract_strided_slice %236 {offsets = [0, 34], sizes = [8, 256], strides = [1, 1]} : vector<8x290xf32> to vector<8x256xf32>
    %297 = vector.broadcast %3 : vector<1x256xf32> to vector<8x256xf32>
    %298 = arith.mulf %296, %297 : vector<8x256xf32>
    %c8_128 = arith.constant 8 : index
    %c0_129 = arith.constant 0 : index
    %c0_130 = arith.constant 0 : index
    %299 = vector.load %arg7[%c8_128, %c0_129, %c0_130] : memref<9x8x1xf32, #tpu.memory_space<vmem>>, vector<1x8x1xf32>
    %300 = vector.shape_cast %299 : vector<1x8x1xf32> to vector<8x1xf32>
    %301 = vector.broadcast %300 : vector<8x1xf32> to vector<8x256xf32>
    %302 = arith.mulf %298, %301 : vector<8x256xf32>
    %303 = arith.addf %295, %302 : vector<8x256xf32>
    %cst_131 = arith.constant dense<0.000000e+00> : vector<256xf32>
    %304 = vector.multi_reduction <add>, %303, %cst_131 [0] : vector<8x256xf32> to vector<256xf32>
    %305 = vector.shape_cast %304 : vector<256xf32> to vector<1x256xf32>
    %c0_132 = arith.constant 0 : index
    %c0_133 = arith.constant 0 : index
    %306 = vector.load %arg8[%c0_132, %c0_133] : memref<1x1xf32, #tpu.memory_space<vmem>>, vector<1x1xf32>
    %307 = vector.broadcast %306 : vector<1x1xf32> to vector<1x256xf32>
    %308 = arith.addf %305, %307 : vector<1x256xf32>
    %309 = arith.negf %308 : vector<1x256xf32>
    %310 = math.exp %309 : vector<1x256xf32>
    %cst_134 = arith.constant 1.000000e+00 : f32
    %311 = vector.broadcast %cst_134 : f32 to vector<1x256xf32>
    %312 = arith.addf %311, %310 : vector<1x256xf32>
    %313 = arith.divf %311, %312 : vector<1x256xf32>
    %c1_135 = arith.constant 1 : index
    %c0_136 = arith.constant 0 : index
    %c0_137 = arith.constant 0 : index
    %314 = vector.load %arg10[%c1_135, %c0_136, %c0_137] : memref<2x1x256xf32, #tpu.memory_space<vmem>>, vector<1x1x256xf32>
    %315 = vector.shape_cast %314 : vector<1x1x256xf32> to vector<1x256xf32>
    %316 = vector.shape_cast %313 : vector<1x256xf32> to vector<1x1x256xf32>
    tpu.vector_store %arg10[%c1_135, %c0_136, %c0_137], %316 {strides = array<i32>} : memref<2x1x256xf32, #tpu.memory_space<vmem>>, vector<1x1x256xf32>,
    return
  }
  func.func @transform_0(%arg0: i32) -> (i32, i32, i32) {
    %c0_i32 = arith.constant 0 : i32
    %c0_i32_0 = arith.constant 0 : i32
    %c0_i32_1 = arith.constant 0 : i32
    %c0_i32_2 = arith.constant 0 : i32
    return %c0_i32, %c0_i32_0, %c0_i32_1 : i32, i32, i32
  }
  func.func @transform_1(%arg0: i32) -> (i32, i32) {
    %c0_i32 = arith.constant 0 : i32
    %c0_i32_0 = arith.constant 0 : i32
    %c0_i32_1 = arith.constant 0 : i32
    return %c0_i32, %c0_i32_0 : i32, i32
  }
  func.func @transform_2(%arg0: i32) -> (i32, i32) {
    %c0_i32 = arith.constant 0 : i32
    %c0_i32_0 = arith.constant 0 : i32
    %c0_i32_1 = arith.constant 0 : i32
    return %c0_i32, %c0_i32_0 : i32, i32
  }
  func.func @transform_3(%arg0: i32) -> (i32, i32, i32) {
    %c0_i32 = arith.constant 0 : i32
    %c0_i32_0 = arith.constant 0 : i32
    %c0_i32_1 = arith.constant 0 : i32
    %c0_i32_2 = arith.constant 0 : i32
    return %c0_i32, %c0_i32_0, %c0_i32_1 : i32, i32, i32
  }
  func.func @transform_4(%arg0: i32) -> (i32, i32) {
    %c0_i32 = arith.constant 0 : i32
    %c0_i32_0 = arith.constant 0 : i32
    %c0_i32_1 = arith.constant 0 : i32
    return %c0_i32, %c0_i32_0 : i32, i32
  }
  func.func @transform_5(%arg0: i32) -> (i32, i32) {
    %c0_i32 = arith.constant 0 : i32
    %c0_i32_0 = arith.constant 0 : i32
    %c0_i32_1 = arith.constant 0 : i32
    return %c0_i32, %c0_i32_0 : i32, i32
  }
  func.func @transform_6(%arg0: i32) -> (i32, i32, i32) {
    %c0_i32 = arith.constant 0 : i32
    %c0_i32_0 = arith.constant 0 : i32
    %c0_i32_1 = arith.constant 0 : i32
    %c0_i32_2 = arith.constant 0 : i32
    return %c0_i32, %c0_i32_0, %c0_i32_1 : i32, i32, i32
  }
  func.func @transform_7(%arg0: i32) -> (i32, i32) {
    %c0_i32 = arith.constant 0 : i32
    %c0_i32_0 = arith.constant 0 : i32
    %c0_i32_1 = arith.constant 0 : i32
    return %c0_i32, %c0_i32_0 : i32, i32
  }
  func.func @transform_8(%arg0: i32) -> (i32, i32, i32) {
    %c0_i32 = arith.constant 0 : i32
    %c0_i32_0 = arith.constant 0 : i32
    %c0_i32_1 = arith.constant 0 : i32
    %c0_i32_2 = arith.constant 0 : i32
    return %c0_i32, %c0_i32_0, %c0_i32_1 : i32, i32, i32
  }
  func.func @transform_9(%arg0: i32) -> (i32, i32, i32) {
    %c0_i32 = arith.constant 0 : i32
    %c0_i32_0 = arith.constant 0 : i32
    %c0_i32_1 = arith.constant 0 : i32
    %c0_i32_2 = arith.constant 0 : i32
    return %c0_i32, %c0_i32_0, %c0_i32_1 : i32, i32, i32
  }
}

</mosaic_0001>

<bundles_post_ra>
// kernel: layer2_forward.1
= control target key start
LH: loop header
LB: loop body
LE: loop exit
PB: predicated region body
PF: predicated region fallthrough
CT: control target
= control target key end

     0   :  { %v87_v0 = vlaneseq  ;;  %v1405_v3 = vmov 0.0   ;;  %s1407_s17 = smov 2   ;;  %s1408_s18 = smov 16   ;;  %vm79_vm0 = vcmask 138240   ;;  %vm129_vm1 = vcmask 15360   ;;  %s2089_s0 = inlined_call_operand.vmem [shape: f32[2,4,256], index: 0, kind: input, shape index: {}]   ;;  %s2090_s3 = inlined_call_operand.vmem [shape: f32[2,1,256], index: 3, kind: input, shape index: {}]   ;;  %s2091_s2 = inlined_call_operand.vmem [shape: f32[8,1], index: 2, kind: input, shape index: {}]   ;;  %s2092_s1 = inlined_call_operand.vmem [shape: f32[8,72], index: 1, kind: input, shape index: {}]   ;;  %s2093_s4 = inlined_call_operand.vmem [shape: f32[8,1], index: 4, kind: input, shape index: {}]   ;;  %s2094_s5 = inlined_call_operand.vmem [shape: f32[8,1], index: 5, kind: input, shape index: {}]   ;;  %s2095_s6 = inlined_call_operand.vmem [shape: f32[9,8,1], index: 6, kind: input, shape index: {}]   ;;  %s2096_s8 = inlined_call_operand.vmem [shape: f32[2,8,256], index: 8, kind: output, shape index: {0}]   ;;  %s2097_s7 = inlined_call_operand.<no memory space> [shape: f32[1,1], index: 7, kind: input, shape index: {}]   ;;  %s2098_s9 = inlined_call_operand.vmem [shape: f32[2,1,256], index: 9, kind: output, shape index: {1}]  }
   0x1   :  { %v1306_v1 = vld [vmem:[%s2089_s0 + $0x8] sm:$0xff]  ;;  %v72_v2 = vld [vmem:[%s2089_s0] sm:$0xff]  ;;  %38 = vst [vmem:[#allocation2 + $0x10] sm:$0xff] %v1405_v3  ;;  %36 = vst [vmem:[#allocation2] sm:$0xff] %v1405_v3  ;;  %548 = vmatprep.mubr.f32.mxu0 %v1405_v3  ;;  %619 = vmatprep.mubr.f32.mxu1 %v1405_v3  ;;  %s1406_s0 = smov 17   ;;  %s1409_s19 = smov 18  }
   0x2   :  { %37 = vst [vmem:[#allocation2 + $0x8] sm:$0xff] %v1405_v3  ;;  %39 = vst [vmem:[#allocation2 + $0x18] sm:$0xff] %v1405_v3  ;;  %295 = vrot.lane.b32.xlu1 %v1306_v1, %s1406_s0  ;;  %v294_v4 = vcombine.high %v1306_v1, %v1306_v1  ;;  %75 = vrot.lane.b32.xlu0 %v72_v2, %s1406_s0  ;;  %v74_v5 = vcombine.high %v72_v2, %v72_v2  ;;  %v1481_v6 = vshrl.u32 %v87_v0, 7  ;;  %v1305_v7 = vld [vmem:[%s2090_s3 + $0x2] sm:$0x3]  ;;  %s1410_s20 = smov 32  }
   0x3   :  { %40 = vst [vmem:[#allocation2 + $0x20] sm:$0xff] %v1405_v3  ;;  %41 = vst [vmem:[#allocation2 + $0x28] sm:$0xff] %v1405_v3  ;;  %v33_v11 = vld [vmem:[%s2090_s3] sm:$0x3]  ;;  %s1411_s3 = smov 34   ;;  %s1412_s21 = smov 127  }
   0x4   :  { %42 = vst [vmem:[#allocation2 + $0x30] sm:$0xff] %v1405_v3  ;;  %43 = vst [vmem:[#allocation2 + $0x38] sm:$0xff] %v1405_v3  ;;  %v1487_v8 = vsub.s32 0, %v1481_v6  ;;  %v93_v9 = vsub.s32 1, %v1481_v6  ;;  %s1413_s22 = smov 95   ;;  %s1414_s23 = smov 111  }
   0x5   :  { %44 = vst [vmem:[#allocation2 + $0x40] sm:$0xff] %v1405_v3  ;;  %45 = vst [vmem:[#allocation2 + $0x48] sm:$0xff] %v1405_v3  ;;  %s1415_s24 = smov 126   ;;  %s1416_s25 = smov 112   ;;  %vm157_vm2 = vcmask 130048   ;;  %vm198_vm3 = vcmask 146432  }
   0x6   :  { %46 = vst [vmem:[#allocation2 + $0x50] sm:$0xff] %v1405_v3  ;;  %47 = vst [vmem:[#allocation2 + $0x58] sm:$0xff] %v1405_v3  ;;  %297 = vrot.lane.b32.xlu1 %v294_v4, %s1406_s0  ;;  %77 = vrot.lane.b32.xlu0 %v74_v5, %s1406_s0  ;;  %v124_v10 = vrot.slane %v1305_v7, %v93_v9  ;;  %v120_v12 = vrot.slane %v1305_v7, %v1487_v8  ;;  %s1417_s26 = smov 96   ;;  %s1418_s27 = smov 110   ;;  %vm226_vm4 = vcmask 261120   ;;  %vm267_vm5 = vcmask 277504  }
   0x7   :  { %48 = vst [vmem:[#allocation2 + $0x60] sm:$0xff] %v1405_v3  ;;  %49 = vst [vmem:[#allocation2 + $0x68] sm:$0xff] %v1405_v3  ;;  %v1497_v13 = vrot.slane %v33_v11, %v1487_v8  ;;  %v1499_v14 = vrot.slane %v33_v11, %v93_v9  ;;  %s1419_s28 = smov 94   ;;  %vm109_vm6 = vcmask 1039360   ;;  %vm187_vm7 = vcmask 908288  }
   0x8   :  { %50 = vst [vmem:[#allocation2 + $0x70] sm:$0xff] %v1405_v3  ;;  %51 = vst [vmem:[#allocation2 + $0x78] sm:$0xff] %v1405_v3  ;;  %vm256_vm8 = vcmask 777216   ;;  %vm146_vm9 = vcmask 1031168   ;;  %vm174_vm10 = vcmask 916480   ;;  %vm215_vm11 = vcmask 900096  }
   0x9   :  { %52 = vst [vmem:[#allocation2 + $0x80] sm:$0xff] %v1405_v3  ;;  %53 = vst [vmem:[#allocation2 + $0x88] sm:$0xff] %v1405_v3  ;;  %vm243_vm12 = vcmask 785408   ;;  %vm284_vm13 = vcmask 769024   ;;  %vm480_vm14 = vcmask 588800   ;;  %vm650_vm15 = vcmp.lt.s32.totalorder %v1481_v6, 4 }
   0xa   :  { %54 = vst [vmem:[#allocation2 + $0x90] sm:$0xff] %v1405_v3  ;;  %55 = vst [vmem:[#allocation2 + $0x98] sm:$0xff] %v1405_v3  ;;  %127 = vrot.lane.b32.xlu1 %v124_v10, %s1407_s17  ;;  %125 = vrot.lane.b32.xlu0 %v120_v12, %s1407_s17 }
   0xb   :  { %56 = vst [vmem:[#allocation2 + $0xa0] sm:$0xff] %v1405_v3  ;;  %57 = vst [vmem:[#allocation2 + $0xa8] sm:$0xff] %v1405_v3 }
   0xc   :  { %58 = vst [vmem:[#allocation2 + $0xb0] sm:$0xff] %v1405_v3  ;;  %59 = vst [vmem:[#allocation2 + $0xb8] sm:$0xff] %v1405_v3 }
   0xd   :  { %60 = vst [vmem:[#allocation2 + $0xc0] sm:$0xff] %v1405_v3  ;;  %61 = vst [vmem:[#allocation2 + $0xc8] sm:$0xff] %v1405_v3 }
   0xe   :  { %62 = vst [vmem:[#allocation2 + $0xd0] sm:$0xff] %v1405_v3  ;;  %63 = vst [vmem:[#allocation2 + $0xd8] sm:$0xff] %v1405_v3  ;;  %155 = vrot.lane.b32.xlu1 %v1499_v14, %s1408_s18  ;;  %153 = vrot.lane.b32.xlu0 %v1497_v13, %s1408_s18 }
   0xf   :  { %64 = vst [vmem:[#allocation2 + $0xe0] sm:$0xff] %v1405_v3  ;;  %65 = vst [vmem:[#allocation2 + $0xe8] sm:$0xff] %v1405_v3 }
  0x10   :  { %66 = vst [vmem:[#allocation2 + $0xf0] sm:$0xff] %v1405_v3  ;;  %67 = vst [vmem:[#allocation2 + $0xf8] sm:$0xff] %v1405_v3 }
  0x11   :  { %68 = vst [vmem:[#allocation2 + $0x100] sm:$0xff] %v1405_v3  ;;  %69 = vst [vmem:[#allocation2 + $0x108] sm:$0xff] %v1405_v3 }
  0x12   :  { %70 = vst [vmem:[#allocation2 + $0x110] sm:$0xff] %v1405_v3  ;;  %71 = vst [vmem:[#allocation2 + $0x118] sm:$0xff] %v1405_v3  ;;  %196 = vrot.lane.b32.xlu1 %v124_v10, %s1409_s19  ;;  %194 = vrot.lane.b32.xlu0 %v120_v12, %s1409_s19 }
  0x16   :  { %224 = vrot.lane.b32.xlu1 %v1499_v14, %s1410_s20  ;;  %222 = vrot.lane.b32.xlu0 %v1497_v13, %s1410_s20 }
  0x1a   :  { %265 = vrot.lane.b32.xlu1 %v124_v10, %s1411_s3  ;;  %263 = vrot.lane.b32.xlu0 %v120_v12, %s1411_s3 }
  0x74   :  { %v296_v15 = vpop.permute.xlu1 %295  ;;  %v76_v16 = vpop.permute.xlu0 %75 }
  0x75   :  { %v1506_v17 = vsel %vm79_vm0, 0.0, %v296_v15  ;;  %v1509_v18 = vsel %vm79_vm0, 0.0, %v76_v16 }
  0x76   :  { %v305_v19 = vmul.f32 %v1506_v17, %v1497_v13  ;;  %v97_v20 = vmul.f32 %v1497_v13, %v1509_v18  ;;  %311 = vrot.lane.b32.xlu1 %v1506_v17, %s1412_s21  ;;  %103 = vrot.lane.b32.xlu0 %v1509_v18, %s1412_s21 }
  0x78   :  { %307 = vst [vmem:[#allocation2 + $0x10] sm:$0xf] %v305_v19  ;;  %99 = vst [vmem:[#allocation2] sm:$0xf] %v97_v20  ;;  %v298_v21 = vpop.permute.xlu1 %297  ;;  %v78_v22 = vpop.permute.xlu0 %77 }
  0x79   :  { %v1520_v23 = vsel %vm79_vm0, %v296_v15, %v298_v21  ;;  %v1523_v24 = vsel %vm79_vm0, %v76_v16, %v78_v22  ;;  %v1538_v27 = vsel %vm79_vm0, %v78_v22, 0.0  ;;  %v1545_v28 = vsel %vm79_vm0, %v298_v21, 0.0  ;;  %v474_v16 = vld [vmem:[%s2091_s2] sm:$0xff] }
  0x7a   :  { %v306_v25 = vmul.f32 %v1520_v23, %v1499_v14  ;;  %v98_v26 = vmul.f32 %v1499_v14, %v1523_v24  ;;  %250 = vrot.lane.b32.xlu1 %v1509_v18, %s1413_s22  ;;  %181 = vrot.lane.b32.xlu0 %v1509_v18, %s1414_s23  ;;  %v1420_v15 = vmov 0  }
  0x7b   :  { %1381 = vset.pattern.permute.xlu0 %v1420_v15  ;;  %1382 = vset.pattern.permute.xlu1 %v1420_v15 }
  0x7c   :  { %308 = vst [vmem:[#allocation2 + $0x18] sm:$0xf] %v306_v25  ;;  %100 = vst [vmem:[#allocation2 + $0x8] sm:$0xf] %v98_v26  ;;  %v1555_v29 = vpop.permute.xlu0 %125  ;;  %v1567_v31 = vpop.permute.xlu1 %127 }
  0x7d   :  { %v136_v33 = vmul.f32 %v1567_v31, %v1538_v27  ;;  %v134_v34 = vmul.f32 %v1555_v29, %v1509_v18  ;;  %v323_v37 = vmul.f32 %v1506_v17, %v1555_v29  ;;  %v325_v39 = vmul.f32 %v1545_v28, %v1567_v31 }
  0x7e   :  { %407 = vrot.lane.b32.xlu1 %v1506_v17, %s1413_s22  ;;  %359 = vrot.lane.b32.xlu0 %v1506_v17, %s1414_s23  ;;  %v1603_v43 = vsel %vm129_vm1, %v1555_v29, %v1567_v31 }
  0x7f   :  { %v135_v45 = vmul.f32 %v1603_v43, %v1523_v24  ;;  %v324_v51 = vmul.f32 %v1520_v23, %v1603_v43 }
  0x80   :  { %v1561_v30 = vpop.permute.xlu0 %153  ;;  %v1579_v35 = vpop.permute.xlu1 %155 }
  0x81   :  { %v164_v36 = vmul.f32 %v1579_v35, %v1538_v27  ;;  %v343_v41 = vmul.f32 %v1545_v28, %v1579_v35  ;;  %v162_v44 = vmul.f32 %v1561_v30, %v1509_v18  ;;  %v1613_v46 = vsel %vm157_vm2, %v1561_v30, %v1579_v35 }
  0x82   :  { %107 = vrot.lane.b32.xlu1 %v1538_v27, %s1412_s21  ;;  %105 = vrot.lane.b32.xlu0 %v1523_v24, %s1412_s21  ;;  %v341_v47 = vmul.f32 %v1506_v17, %v1561_v30  ;;  %v163_v48 = vmul.f32 %v1613_v46, %v1523_v24  ;;  %v342_v53 = vmul.f32 %v1520_v23, %v1613_v46 }
  0x84   :  { %v1573_v32 = vpop.permute.xlu0 %194  ;;  %v1621_v49 = vpop.permute.xlu1 %196 }
  0x85   :  { %v205_v50 = vmul.f32 %v1621_v49, %v1538_v27  ;;  %v373_v52 = vmul.f32 %v1545_v28, %v1621_v49  ;;  %v1637_v54 = vsel %vm198_vm3, %v1573_v32, %v1621_v49  ;;  %v203_v55 = vmul.f32 %v1573_v32, %v1509_v18 }
  0x86   :  { %315 = vrot.lane.b32.xlu1 %v1545_v28, %s1412_s21  ;;  %313 = vrot.lane.b32.xlu0 %v1520_v23, %s1412_s21  ;;  %v204_v56 = vmul.f32 %v1637_v54, %v1523_v24  ;;  %v371_v58 = vmul.f32 %v1506_v17, %v1573_v32  ;;  %v372_v59 = vmul.f32 %v1520_v23, %v1637_v54 }
  0x88   :  { %v1587_v38 = vpop.permute.xlu0 %222  ;;  %v1645_v57 = vpop.permute.xlu1 %224 }
  0x89   :  { %v231_v40 = vmul.f32 %v1587_v38, %v1509_v18  ;;  %v389_v42 = vmul.f32 %v1506_v17, %v1587_v38  ;;  %v1655_v60 = vsel %vm226_vm4, %v1587_v38, %v1645_v57  ;;  %v233_v61 = vmul.f32 %v1645_v57, %v1538_v27 }
  0x8a   :  { %185 = vrot.lane.b32.xlu1 %v1538_v27, %s1414_s23  ;;  %183 = vrot.lane.b32.xlu0 %v1523_v24, %s1414_s23  ;;  %v232_v62 = vmul.f32 %v1655_v60, %v1523_v24  ;;  %v391_v2 = vmul.f32 %v1545_v28, %v1645_v57  ;;  %v390_v3 = vmul.f32 %v1520_v23, %v1655_v60 }
  0x8c   :  { %v1663_v63 = vpop.permute.xlu1 %265  ;;  %v1665_v1 = vpop.permute.xlu0 %263 }
  0x8d   :  { %v1675_v4 = vsel %vm267_vm5, %v1665_v1, %v1663_v63  ;;  %v274_v5 = vmul.f32 %v1663_v63, %v1538_v27  ;;  %v421_v9 = vmul.f32 %v1545_v28, %v1663_v63  ;;  %v419_v11 = vmul.f32 %v1506_v17, %v1665_v1 }
  0x8e   :  { %363 = vrot.lane.b32.xlu1 %v1545_v28, %s1414_s23  ;;  %361 = vrot.lane.b32.xlu0 %v1520_v23, %s1414_s23  ;;  %v273_v7 = vmul.f32 %v1675_v4, %v1523_v24  ;;  %v420_v10 = vmul.f32 %v1520_v23, %v1675_v4  ;;  %v272_v12 = vmul.f32 %v1665_v1, %v1509_v18 }
  0x92   :  { %254 = vrot.lane.b32.xlu1 %v1538_v27, %s1413_s22  ;;  %252 = vrot.lane.b32.xlu0 %v1523_v24, %s1413_s22 }
  0x96   :  { %411 = vrot.lane.b32.xlu1 %v1545_v28, %s1413_s22  ;;  %409 = vrot.lane.b32.xlu0 %v1520_v23, %s1413_s22 }
  0x9a   :  { %144 = vrot.lane.b32.xlu1 %v136_v33, %s1415_s24  ;;  %140 = vrot.lane.b32.xlu0 %v134_v34, %s1415_s24 }
  0x9e   :  { %172 = vrot.lane.b32.xlu1 %v164_v36, %s1416_s25  ;;  %329 = vrot.lane.b32.xlu0 %v323_v37, %s1415_s24 }
  0xa2   :  { %333 = vrot.lane.b32.xlu1 %v325_v39, %s1415_s24  ;;  %237 = vrot.lane.b32.xlu0 %v231_v40, %s1417_s26  ;;  %v438_v39 = vld [vmem:[#allocation2] sm:$0xff] }
  0xa6   :  { %351 = vrot.lane.b32.xlu1 %v343_v41, %s1416_s25  ;;  %395 = vrot.lane.b32.xlu0 %v389_v42, %s1417_s26  ;;  %v439_v42 = vld [vmem:[#allocation2 + $0x8] sm:$0xff] }
  0xaa   :  { %168 = vrot.lane.b32.xlu1 %v162_v44, %s1416_s25  ;;  %142 = vrot.lane.b32.xlu0 %v135_v45, %s1415_s24 }
  0xae   :  { %347 = vrot.lane.b32.xlu1 %v341_v47, %s1416_s25  ;;  %170 = vrot.lane.b32.xlu0 %v163_v48, %s1416_s25 }
  0xb2   :  { %213 = vrot.lane.b32.xlu1 %v205_v50, %s1418_s27  ;;  %331 = vrot.lane.b32.xlu0 %v324_v51, %s1415_s24 }
  0xb6   :  { %381 = vrot.lane.b32.xlu1 %v373_v52, %s1418_s27  ;;  %349 = vrot.lane.b32.xlu0 %v342_v53, %s1416_s25  ;;  %v440_v52 = vld [vmem:[#allocation2 + $0x10] sm:$0xff] }
  0xba   :  { %209 = vrot.lane.b32.xlu1 %v203_v55, %s1418_s27  ;;  %211 = vrot.lane.b32.xlu0 %v204_v56, %s1418_s27  ;;  %v441_v56 = vld [vmem:[#allocation2 + $0x18] sm:$0xff] }
  0xbe   :  { %377 = vrot.lane.b32.xlu1 %v371_v58, %s1418_s27  ;;  %379 = vrot.lane.b32.xlu0 %v372_v59, %s1418_s27 }
  0xc2   :  { %241 = vrot.lane.b32.xlu1 %v233_v61, %s1417_s26  ;;  %239 = vrot.lane.b32.xlu0 %v232_v62, %s1417_s26 }
  0xc6   :  { %399 = vrot.lane.b32.xlu1 %v391_v2, %s1417_s26  ;;  %397 = vrot.lane.b32.xlu0 %v390_v3, %s1417_s26 }
  0xca   :  { %282 = vrot.lane.b32.xlu1 %v274_v5, %s1419_s28  ;;  %280 = vrot.lane.b32.xlu0 %v273_v7, %s1419_s28 }
  0xce   :  { %429 = vrot.lane.b32.xlu1 %v421_v9, %s1419_s28  ;;  %427 = vrot.lane.b32.xlu0 %v420_v10, %s1419_s28 }
  0xd2   :  { %425 = vrot.lane.b32.xlu1 %v419_v11, %s1419_s28  ;;  %278 = vrot.lane.b32.xlu0 %v272_v12, %s1419_s28 }
  0xd6   :  { %477 = vperm.xlu0 %1381, %v474_v16  }
  0xe8   :  { %v312_v19 = vpop.permute.xlu1 %311  ;;  %v104_v20 = vpop.permute.xlu0 %103 }
  0xec   :  { %v251_v21 = vpop.permute.xlu1 %250  ;;  %v182_v22 = vpop.permute.xlu0 %181 }
  0xf0   :  { %v408_v17 = vpop.permute.xlu1 %407  ;;  %v360_v23 = vpop.permute.xlu0 %359 }
  0xf4   :  { %v108_v18 = vpop.permute.xlu1 %107  ;;  %v106_v24 = vpop.permute.xlu0 %105 }
  0xf5   :  { %v110_v25 = vsel %vm109_vm6, %v104_v20, %v106_v24  ;;  %v111_v26 = vsel %vm109_vm6, %v106_v24, %v108_v18 }
  0xf6   :  { %114 = vst [vmem:[#allocation2 + $0x20] sm:$0xf] %v110_v25  ;;  %115 = vst [vmem:[#allocation2 + $0x28] sm:$0xf] %v111_v26 }
  0xf8   :  { %v316_v27 = vpop.permute.xlu1 %315  ;;  %v314_v28 = vpop.permute.xlu0 %313 }
  0xf9   :  { %v317_v33 = vsel %vm109_vm6, %v312_v19, %v314_v28  ;;  %v318_v34 = vsel %vm109_vm6, %v314_v28, %v316_v27 }
  0xfa   :  { %321 = vst [vmem:[#allocation2 + $0x30] sm:$0xf] %v317_v33  ;;  %322 = vst [vmem:[#allocation2 + $0x38] sm:$0xf] %v318_v34 }
  0xfc   :  { %v186_v36 = vpop.permute.xlu1 %185  ;;  %v184_v37 = vpop.permute.xlu0 %183 }
  0xfd   :  { %v188_v40 = vsel %vm187_vm7, %v182_v22, %v184_v37  ;;  %v189_v41 = vsel %vm187_vm7, %v184_v37, %v186_v36  ;;  %v443_v44 = vld [vmem:[#allocation2 + $0x28] sm:$0xff]  ;;  %v442_v45 = vld [vmem:[#allocation2 + $0x20] sm:$0xff] }
  0xfe   :  { %192 = vst [vmem:[#allocation2 + $0x80] sm:$0xf] %v188_v40  ;;  %193 = vst [vmem:[#allocation2 + $0x88] sm:$0xf] %v189_v41  ;;  %v1332_v47 = vpack.c.bf16 %v443_v44, %v439_v42  ;;  %v1334_v48 = vpack.c.bf16 %v442_v45, %v438_v39 }
 0x100   :  { %v364_v50 = vpop.permute.xlu1 %363  ;;  %1333 = vmatprep.subr.bf16.mxu0 %v1332_v47  ;;  %v362_v51 = vpop.permute.xlu0 %361 }
 0x101   :  { %v365_v53 = vsel %vm187_vm7, %v360_v23, %v362_v51  ;;  %v366_v55 = vsel %vm187_vm7, %v362_v51, %v364_v50  ;;  %1335 = vmatpush1.bf16.msra.mxu0 %v1334_v48  ;;  %v445_v58 = vld [vmem:[#allocation2 + $0x38] sm:$0xff]  ;;  %v444_v59 = vld [vmem:[#allocation2 + $0x30] sm:$0xff] }
 0x102   :  { %369 = vst [vmem:[#allocation2 + $0x90] sm:$0xf] %v365_v53  ;;  %370 = vst [vmem:[#allocation2 + $0x98] sm:$0xf] %v366_v55  ;;  %v1348_v61 = vpack.c.bf16 %v445_v58, %v441_v56  ;;  %v1350_v62 = vpack.c.bf16 %v444_v59, %v440_v52 }
 0x104   :  { %v255_v2 = vpop.permute.xlu1 %254  ;;  %1349 = vmatprep.subr.bf16.mxu1 %v1348_v61  ;;  %v253_v3 = vpop.permute.xlu0 %252 }
 0x105   :  { %v257_v5 = vsel %vm256_vm8, %v251_v21, %v253_v3  ;;  %v258_v7 = vsel %vm256_vm8, %v253_v3, %v255_v2  ;;  %1351 = vmatpush1.bf16.msra.mxu1 %v1350_v62 }
 0x106   :  { %261 = vst [vmem:[#allocation2 + $0xe0] sm:$0xf] %v257_v5  ;;  %262 = vst [vmem:[#allocation2 + $0xe8] sm:$0xf] %v258_v7 }
 0x108   :  { %v412_v9 = vpop.permute.xlu1 %411  ;;  %v410_v10 = vpop.permute.xlu0 %409 }
 0x109   :  { %v413_v11 = vsel %vm256_vm8, %v408_v17, %v410_v10  ;;  %v414_v12 = vsel %vm256_vm8, %v410_v10, %v412_v9 }
 0x10a   :  { %417 = vst [vmem:[#allocation2 + $0xf0] sm:$0xf] %v413_v11  ;;  %418 = vst [vmem:[#allocation2 + $0xf8] sm:$0xf] %v414_v12 }
 0x10c   :  { %v145_v15 = vpop.permute.xlu1 %144  ;;  %v141_v16 = vpop.permute.xlu0 %140 }
 0x110   :  { %v173_v19 = vpop.permute.xlu1 %172  ;;  %v330_v20 = vpop.permute.xlu0 %329 }
 0x114   :  { %v334_v22 = vpop.permute.xlu1 %333  ;;  %v238_v23 = vpop.permute.xlu0 %237 }
 0x118   :  { %v352_v21 = vpop.permute.xlu1 %351  ;;  %v1712_v18 = vpop.permute.xlu0 %395 }
 0x11c   :  { %v169_v24 = vpop.permute.xlu1 %168  ;;  %v143_v25 = vpop.permute.xlu0 %142 }
 0x11d   :  { %v147_v26 = vsel %vm146_vm9, %v141_v16, %v143_v25  ;;  %v148_v17 = vsel %vm146_vm9, %v143_v25, %v145_v15 }
 0x11e   :  { %151 = vst [vmem:[#allocation2 + $0x40] sm:$0xf] %v147_v26  ;;  %152 = vst [vmem:[#allocation2 + $0x48] sm:$0xf] %v148_v17 }
 0x120   :  { %v348_v27 = vpop.permute.xlu1 %347  ;;  %v171_v28 = vpop.permute.xlu0 %170 }
 0x121   :  { %v175_v33 = vsel %vm174_vm10, %v169_v24, %v171_v28  ;;  %v176_v34 = vsel %vm174_vm10, %v171_v28, %v173_v19  ;;  %v455_v19 = vld [vmem:[#allocation2 + $0x88] sm:$0xff]  ;;  %v454_v24 = vld [vmem:[#allocation2 + $0x80] sm:$0xff] }
 0x122   :  { %179 = vst [vmem:[#allocation2 + $0x60] sm:$0xf] %v175_v33  ;;  %180 = vst [vmem:[#allocation2 + $0x68] sm:$0xf] %v176_v34  ;;  %v457_v33 = vld [vmem:[#allocation2 + $0x98] sm:$0xff] }
 0x124   :  { %v214_v36 = vpop.permute.xlu1 %213  ;;  %v332_v37 = vpop.permute.xlu0 %331 }
 0x125   :  { %v335_v39 = vsel %vm146_vm9, %v330_v20, %v332_v37  ;;  %v336_v40 = vsel %vm146_vm9, %v332_v37, %v334_v22  ;;  %v447_v44 = vld [vmem:[#allocation2 + $0x48] sm:$0xff]  ;;  %v446_v50 = vld [vmem:[#allocation2 + $0x40] sm:$0xff]  ;;  %v456_v37 = vld [vmem:[#allocation2 + $0x90] sm:$0xff] }
 0x126   :  { %339 = vst [vmem:[#allocation2 + $0x50] sm:$0xf] %v335_v39  ;;  %340 = vst [vmem:[#allocation2 + $0x58] sm:$0xf] %v336_v40 }
 0x128   :  { %v382_v41 = vpop.permute.xlu1 %381  ;;  %v350_v42 = vpop.permute.xlu0 %349 }
 0x129   :  { %v353_v45 = vsel %vm174_vm10, %v348_v27, %v350_v42  ;;  %v354_v47 = vsel %vm174_vm10, %v350_v42, %v352_v21  ;;  %v451_v48 = vld [vmem:[#allocation2 + $0x68] sm:$0xff]  ;;  %v450_v51 = vld [vmem:[#allocation2 + $0x60] sm:$0xff] }
 0x12a   :  { %357 = vst [vmem:[#allocation2 + $0x70] sm:$0xf] %v353_v45  ;;  %358 = vst [vmem:[#allocation2 + $0x78] sm:$0xf] %v354_v47  ;;  %v1336_v52 = vpack.c.bf16 %v451_v48, %v447_v44  ;;  %v1338_v53 = vpack.c.bf16 %v450_v51, %v446_v50  ;;  %v467_v45 = vld [vmem:[#allocation2 + $0xe8] sm:$0xff]  ;;  %v466_v50 = vld [vmem:[#allocation2 + $0xe0] sm:$0xff] }
 0x12c   :  { %v210_v55 = vpop.permute.xlu1 %209  ;;  %1337 = vmatprep.subr.bf16.mxu0 %v1336_v52  ;;  %v212_v56 = vpop.permute.xlu0 %211 }
 0x12d   :  { %v216_v58 = vsel %vm215_vm11, %v210_v55, %v212_v56  ;;  %v217_v59 = vsel %vm215_vm11, %v212_v56, %v214_v36  ;;  %1339 = vmatpush1.bf16.msra.mxu0 %v1338_v53  ;;  %v449_v2 = vld [vmem:[#allocation2 + $0x58] sm:$0xff]  ;;  %v448_v9 = vld [vmem:[#allocation2 + $0x50] sm:$0xff] }
 0x12e   :  { %220 = vst [vmem:[#allocation2 + $0xa0] sm:$0xf] %v216_v58  ;;  %221 = vst [vmem:[#allocation2 + $0xa8] sm:$0xf] %v217_v59  ;;  %v469_v56 = vld [vmem:[#allocation2 + $0xf8] sm:$0xff] }
 0x130   :  { %v378_v61 = vpop.permute.xlu1 %377  ;;  %v380_v62 = vpop.permute.xlu0 %379 }
 0x131   :  { %v383_v3 = vsel %vm215_vm11, %v378_v61, %v380_v62  ;;  %v384_v5 = vsel %vm215_vm11, %v380_v62, %v382_v41  ;;  %v453_v7 = vld [vmem:[#allocation2 + $0x78] sm:$0xff]  ;;  %v452_v10 = vld [vmem:[#allocation2 + $0x70] sm:$0xff] }
 0x132   :  { %387 = vst [vmem:[#allocation2 + $0xb0] sm:$0xf] %v383_v3  ;;  %388 = vst [vmem:[#allocation2 + $0xb8] sm:$0xf] %v384_v5  ;;  %v1352_v11 = vpack.c.bf16 %v453_v7, %v449_v2  ;;  %v1354_v12 = vpack.c.bf16 %v452_v10, %v448_v9  ;;  %v468_v62 = vld [vmem:[#allocation2 + $0xf0] sm:$0xff] }
 0x134   :  { %v242_v15 = vpop.permute.xlu1 %241  ;;  %1353 = vmatprep.subr.bf16.mxu1 %v1352_v11  ;;  %v240_v16 = vpop.permute.xlu0 %239 }
 0x135   :  { %v244_v20 = vsel %vm243_vm12, %v238_v23, %v240_v16  ;;  %v245_v22 = vsel %vm243_vm12, %v240_v16, %v242_v15  ;;  %1355 = vmatpush1.bf16.msra.mxu1 %v1354_v12  ;;  %v459_v21 = vld [vmem:[#allocation2 + $0xa8] sm:$0xff]  ;;  %v458_v25 = vld [vmem:[#allocation2 + $0xa0] sm:$0xff] }
 0x136   :  { %248 = vst [vmem:[#allocation2 + $0xc0] sm:$0xf] %v244_v20  ;;  %249 = vst [vmem:[#allocation2 + $0xc8] sm:$0xf] %v245_v22  ;;  %v1340_v26 = vpack.c.bf16 %v459_v21, %v455_v19  ;;  %v1342_v17 = vpack.c.bf16 %v458_v25, %v454_v24  ;;  %v437_v15 = vld [vmem:[%s2092_s1] sm:$0xff] }
 0x138   :  { %v400_v27 = vpop.permute.xlu1 %399  ;;  %1341 = vmatprep.subr.bf16.mxu0 %v1340_v26  ;;  %v398_v28 = vpop.permute.xlu0 %397 }
 0x139   :  { %v401_v34 = vsel %vm243_vm12, %v1712_v18, %v398_v28  ;;  %v402_v36 = vsel %vm243_vm12, %v398_v28, %v400_v27  ;;  %1343 = vmatpush1.bf16.msra.mxu0 %v1342_v17  ;;  %v461_v23 = vld [vmem:[#allocation2 + $0xb8] sm:$0xff]  ;;  %v460_v39 = vld [vmem:[#allocation2 + $0xb0] sm:$0xff] }
 0x13a   :  { %405 = vst [vmem:[#allocation2 + $0xd0] sm:$0xf] %v401_v34  ;;  %406 = vst [vmem:[#allocation2 + $0xd8] sm:$0xf] %v402_v36  ;;  %v1356_v40 = vpack.c.bf16 %v461_v23, %v457_v33  ;;  %v1358_v41 = vpack.c.bf16 %v460_v39, %v456_v37 }
 0x13c   :  { %v283_v42 = vpop.permute.xlu1 %282  ;;  %1357 = vmatprep.subr.bf16.mxu1 %v1356_v40  ;;  %v281_v44 = vpop.permute.xlu0 %280 }
 0x13d   :  { %v286_v47 = vsel %vm284_vm13, %v281_v44, %v283_v42  ;;  %1359 = vmatpush1.bf16.msra.mxu1 %v1358_v41  ;;  %v463_v48 = vld [vmem:[#allocation2 + $0xc8] sm:$0xff]  ;;  %v462_v18 = vld [vmem:[#allocation2 + $0xc0] sm:$0xff] }
 0x13e   :  { %290 = vst [vmem:[#allocation2 + $0x108] sm:$0xf] %v286_v47  ;;  %v1344_v51 = vpack.c.bf16 %v467_v45, %v463_v48  ;;  %v1346_v52 = vpack.c.bf16 %v466_v50, %v462_v18 }
 0x140   :  { %v430_v53 = vpop.permute.xlu1 %429  ;;  %1345 = vmatprep.subr.bf16.mxu0 %v1344_v51  ;;  %v428_v55 = vpop.permute.xlu0 %427 }
 0x141   :  { %v432_v58 = vsel %vm284_vm13, %v428_v55, %v430_v53  ;;  %1347 = vmatpush1.bf16.msra.mxu0 %v1346_v52  ;;  %v465_v59 = vld [vmem:[#allocation2 + $0xd8] sm:$0xff]  ;;  %v464_v61 = vld [vmem:[#allocation2 + $0xd0] sm:$0xff] }
 0x142   :  { %436 = vst [vmem:[#allocation2 + $0x118] sm:$0xf] %v432_v58  ;;  %v1360_v2 = vpack.c.bf16 %v469_v56, %v465_v59  ;;  %v1362_v3 = vpack.c.bf16 %v468_v62, %v464_v61 }
 0x144   :  { %v426_v5 = vpop.permute.xlu1 %425  ;;  %1361 = vmatprep.subr.bf16.mxu1 %v1360_v2  ;;  %v279_v7 = vpop.permute.xlu0 %278 }
 0x145   :  { %v431_v9 = vsel %vm284_vm13, %v426_v5, %v428_v55  ;;  %v285_v10 = vsel %vm284_vm13, %v279_v7, %v281_v44  ;;  %1363 = vmatpush1.bf16.msra.mxu1 %v1362_v3  ;;  %v471_v11 = vld [vmem:[#allocation2 + $0x108] sm:$0xff] }
 0x146   :  { %435 = vst [vmem:[#allocation2 + $0x110] sm:$0xf] %v431_v9  ;;  %289 = vst [vmem:[#allocation2 + $0x100] sm:$0xf] %v285_v10  ;;  %500 = vmatprep.subr.mxu0 %v471_v11  ;;  %v651_v11 = vld [vmem:[%s2093_s4] sm:$0xff] }
 0x149   :  { %v473_v12 = vld [vmem:[#allocation2 + $0x118] sm:$0xff] }
 0x14a   :  { %571 = vmatprep.subr.mxu1 %v473_v12 }
 0x14d   :  { %v470_v16 = vld [vmem:[#allocation2 + $0x100] sm:$0xff]  ;;  %v472_v19 = vld [vmem:[#allocation2 + $0x110] sm:$0xff] }
 0x14e   :  { %501 = vmatpush1.msra.mxu0 %v470_v16  ;;  %572 = vmatpush1.msra.mxu1 %v472_v19 }
 0x14f   :  { %1307 = vmatmul.mubr.msk.f32.vlgmr.msra.gmra.mrb[0].mxu0 %vm480_vm14, %v437_v15  ;;  %1308 = vmatmul.mubr.msk.f32.vlgmr.msra.gmra.mrb[0].mxu1 %vm480_vm14, %v437_v15 }
 0x155   :  { %v478_v20 = vpop.permute.xlu0 %477 }
 0x222   :  { %v550_v22 = vpop.f32.mrb[0].mxu0  ;;  %v621_v21 = vpop.f32.mrb[0].mxu1 }
 0x223   :  { %v1738_v24 = vadd.f32 %v550_v22, %v478_v20  ;;  %v1740_v25 = vadd.f32 %v621_v21, %v478_v20  ;;  %v552_v26 = vpop.f32.mrb[1].mxu0  ;;  %v623_v17 = vpop.f32.mrb[1].mxu1  ;;  %v652_v22 = vld [vmem:[%s2094_s5] sm:$0xff] }
 0x224   :  { %v1742_v27 = vadd.f32 %v552_v26, %v478_v20  ;;  %v1744_v28 = vadd.f32 %v623_v17, %v478_v20  ;;  %v1309_v17 = vld [vmem:[%s2095_s6 + $0x8] sm:$0xff] }
 0x225   :  { %v637_v33 = vmul.f32 %v1740_v25, %v1740_v25  ;;  %v629_v34 = vmul.f32 %v1738_v24, %v1738_v24 }
 0x226   :  { %v634_v36 = vadd.f32 %v1744_v28, %v1740_v25  ;;  %v626_v23 = vadd.f32 %v1742_v27, %v1738_v24  ;;  %v638_v37 = vmul.f32 %v1744_v28, %v1744_v28  ;;  %v630_v39 = vmul.f32 %v1742_v27, %v1742_v27 }
 0x228   :  { %635 = vadd.xlane.f32.xlu0 %v634_v36  ;;  %627 = vadd.xlane.f32.xlu1 %v626_v23  ;;  %v639_v40 = vadd.f32 %v638_v37, %v637_v33  ;;  %v631_v41 = vadd.f32 %v630_v39, %v629_v34  ;;  %v1310_v36 = vld [vmem:[%s2095_s6 + $0x10] sm:$0xff]  ;;  %v1311_v37 = vld [vmem:[%s2095_s6 + $0x18] sm:$0xff]  ;;  %v1312_v39 = vld [vmem:[%s2095_s6 + $0x20] sm:$0xff] }
 0x22c   :  { %640 = vadd.xlane.f32.xlu0 %v639_v40  ;;  %632 = vadd.xlane.f32.xlu1 %v631_v41  ;;  %v1313_v40 = vld [vmem:[%s2095_s6 + $0x28] sm:$0xff]  ;;  %v1314_v41 = vld [vmem:[%s2095_s6 + $0x30] sm:$0xff] }
 0x2b5   :  { %v636_v42 = vpop.xlane.xlu0 %635  ;;  %v628_v44 = vpop.xlane.xlu1 %627 }
 0x2b6   :  { %v642_v45 = vadd.f32 %v636_v42, %v628_v44  ;;  %v980_v47 = vmul.f32 0.00390625, %v636_v42  ;;  %v653_v18 = vmul.f32 0.00390625, %v628_v44  ;;  %v1315_v42 = vld [vmem:[%s2095_s6 + $0x38] sm:$0xff]  ;;  %v1316_v44 = vld [vmem:[%s2095_s6 + $0x40] sm:$0xff] }
 0x2b8   :  { %v644_v48 = vmul.f32 0.001953125, %v642_v45  ;;  %v982_v56 = vmul.f32 %v980_v47, %v980_v47  ;;  %v655_v58 = vmul.f32 %v653_v18, %v653_v18  ;;  %v696_v45 = vld [vmem:[%s2095_s6] sm:$0xff] }
 0x2b9   :  { %v641_v50 = vpop.xlane.xlu0 %640  ;;  %v633_v51 = vpop.xlane.xlu1 %632 }
 0x2ba   :  { %v981_v52 = vmul.f32 0.00390625, %v641_v50  ;;  %v643_v53 = vadd.f32 %v641_v50, %v633_v51  ;;  %v654_v55 = vmul.f32 0.00390625, %v633_v51  ;;  %v646_v59 = vmul.f32 %v644_v48, %v644_v48 }
 0x2bb   :  { %v657_v19 = vsel %vm650_vm15, %v644_v48, %v653_v18  ;;  %v984_v26 = vsel %vm650_vm15, %v644_v48, %v980_v47 }
 0x2bc   :  { %v645_v61 = vmul.f32 0.001953125, %v643_v53  ;;  %v983_v62 = vsub.f32 %v981_v52, %v982_v56  ;;  %v656_v3 = vsub.f32 %v654_v55, %v655_v58 }
 0x2be   :  { %v647_v2 = vsub.f32 %v645_v61, %v646_v59 }
 0x2c0   :  { %v658_v5 = vsel %vm650_vm15, %v647_v2, %v656_v3  ;;  %v985_v7 = vsel %vm650_vm15, %v647_v2, %v983_v62 }
 0x2c1   :  { %v659_v9 = vadd.f32 1e-05, %v658_v5  ;;  %v986_v10 = vadd.f32 1e-05, %v985_v7 }
 0x2c3   :  { %1385 = vrsqrt.f32 %v659_v9 }
 0x2c4   :  { %1387 = vrsqrt.f32 %v986_v10 }
 0x2cd   :  { %v1386_v12 = vpop.eup %1385 }
 0x2ce   :  { %v1388_v15 = vpop.eup %1387  ;;  %v661_v16 = vmul.f32 %v1386_v12, %v651_v11  ;;  %v15_v12 = vstv %s2097_s7 }
 0x2cf   :  { %v988_v20 = vmul.f32 %v1388_v15, %v651_v11  ;;  %16 = vst [vmem:[#allocation3] sm:$0x1] %v15_v12 }
 0x2d0   :  { %666 = vperm.xlu1 %1382, %v661_v16   ;;  %v662_v21 = vmul.f32 %v661_v16, %v657_v19 }
 0x2d1   :  { %993 = vperm.xlu0 %1381, %v988_v20   ;;  %v989_v34 = vmul.f32 %v988_v20, %v984_v26 }
 0x2d2   :  { %v663_v33 = vsub.f32 %v652_v22, %v662_v21 }
 0x2d3   :  { %v990_v23 = vsub.f32 %v652_v22, %v989_v34 }
 0x2d4   :  { %673 = vperm.xlu1 %1382, %v663_v33  }
 0x2d5   :  { %710 = vperm.xlu0 %1381, %v1309_v17  }
 0x2d8   :  { %1000 = vperm.xlu1 %1382, %v990_v23  }
 0x2d9   :  { %738 = vperm.xlu0 %1381, %v1310_v36  }
 0x2dc   :  { %1037 = vperm.xlu1 %1382, %v1309_v17  }
 0x2dd   :  { %766 = vperm.xlu0 %1381, %v1311_v37  }
 0x2e0   :  { %1064 = vperm.xlu1 %1382, %v1310_v36  }
 0x2e1   :  { %791 = vperm.xlu0 %1381, %v1312_v39  }
 0x2e4   :  { %1091 = vperm.xlu1 %1382, %v1311_v37  }
 0x2e5   :  { %819 = vperm.xlu0 %1381, %v1313_v40  }
 0x2e8   :  { %1115 = vperm.xlu1 %1382, %v1312_v39  }
 0x2e9   :  { %847 = vperm.xlu0 %1381, %v1314_v41  }
 0x2ec   :  { %1142 = vperm.xlu1 %1382, %v1313_v40  }
 0x2ed   :  { %872 = vperm.xlu0 %1381, %v1315_v42  }
 0x2f0   :  { %1169 = vperm.xlu1 %1382, %v1314_v41  }
 0x2f1   :  { %900 = vperm.xlu0 %1381, %v1316_v44  }
 0x2f4   :  { %1193 = vperm.xlu1 %1382, %v1315_v42  }
 0x2f5   :  { %699 = vperm.xlu0 %1381, %v696_v45  }
 0x2f8   :  { %1220 = vperm.xlu1 %1382, %v1316_v44  }
 0x2fc   :  { %1027 = vperm.xlu1 %1382, %v696_v45  }
 0x34f   :  { %v667_v47 = vpop.permute.xlu1 %666 }
 0x350   :  { %v669_v48 = vmul.f32 %v667_v47, %v1738_v24  ;;  %v670_v18 = vmul.f32 %v667_v47, %v1742_v27  ;;  %v994_v50 = vpop.permute.xlu0 %993 }
 0x351   :  { %v996_v55 = vmul.f32 %v994_v50, %v1740_v25  ;;  %v997_v56 = vmul.f32 %v994_v50, %v1744_v28 }
 0x353   :  { %v674_v51 = vpop.permute.xlu1 %673 }
 0x354   :  { %v676_v52 = vadd.f32 %v674_v51, %v669_v48  ;;  %v677_v53 = vadd.f32 %v674_v51, %v670_v18  ;;  %v711_v28 = vpop.permute.xlu0 %710 }
 0x356   :  { %v678_v58 = vmax.f32 %v676_v52, 0.0  ;;  %v679_v59 = vmax.f32 %v677_v53, 0.0 }
 0x357   :  { %v1001_v61 = vpop.permute.xlu1 %1000 }
 0x358   :  { %680 = vst [vmem:[%s2096_s8] sm:$0xff] %v678_v58  ;;  %681 = vst [vmem:[%s2096_s8 + $0x8] sm:$0xff] %v679_v59  ;;  %v1003_v24 = vadd.f32 %v1001_v61, %v996_v55  ;;  %v1004_v27 = vadd.f32 %v1001_v61, %v997_v56  ;;  %686 = vrot.lane.b32.xlu1 %v679_v59, %s1406_s0  ;;  %684 = vrot.lane.b32.xlu0 %v678_v58, %s1406_s0  ;;  %v1820_v3 = vpop.permute.xlu0 %738 }
 0x35a   :  { %v1005_v25 = vmax.f32 %v1003_v24, 0.0  ;;  %v1006_v62 = vmax.f32 %v1004_v27, 0.0 }
 0x35b   :  { %v1038_v2 = vpop.permute.xlu1 %1037 }
 0x35c   :  { %1319 = vst [vmem:[%s2096_s8 + $0x10] sm:$0xff] %v1005_v25  ;;  %1320 = vst [vmem:[%s2096_s8 + $0x18] sm:$0xff] %v1006_v62  ;;  %1014 = vrot.lane.b32.xlu0 %v1006_v62, %s1406_s0  ;;  %1012 = vrot.lane.b32.xlu1 %v1005_v25, %s1406_s0  ;;  %v1824_v7 = vpop.permute.xlu0 %766 }
 0x35f   :  { %v1822_v5 = vpop.permute.xlu1 %1064 }
 0x360   :  { %v792_v10 = vpop.permute.xlu0 %791 }
 0x363   :  { %v1826_v9 = vpop.permute.xlu1 %1091 }
 0x364   :  { %v1831_v15 = vpop.permute.xlu0 %819 }
 0x367   :  { %v1116_v11 = vpop.permute.xlu1 %1115 }
 0x368   :  { %v1835_v19 = vpop.permute.xlu0 %847 }
 0x36b   :  { %v1833_v16 = vpop.permute.xlu1 %1142 }
 0x36c   :  { %v873_v22 = vpop.permute.xlu0 %872 }
 0x36f   :  { %v1837_v20 = vpop.permute.xlu1 %1169 }
 0x370   :  { %v1839_v26 = vpop.permute.xlu0 %900 }
 0x373   :  { %v1194_v21 = vpop.permute.xlu1 %1193 }
 0x374   :  { %v700_v33 = vpop.permute.xlu0 %699 }
 0x377   :  { %v1841_v17 = vpop.permute.xlu1 %1220 }
 0x37b   :  { %v1028_v34 = vpop.permute.xlu1 %1027 }
 0x3ca   :  { %v685_v36 = vpop.permute.xlu0 %684  ;;  %v687_v23 = vpop.permute.xlu1 %686 }
 0x3cb   :  { %v1844_v37 = vsel %vm79_vm0, 0.0, %v685_v36  ;;  %v1847_v39 = vsel %vm79_vm0, %v685_v36, %v687_v23  ;;  %v1852_v42 = vsel %vm79_vm0, %v687_v23, 0.0 }
 0x3cc   :  { %v713_v40 = vmul.f32 %v711_v28, %v1844_v37  ;;  %v714_v41 = vmul.f32 %v711_v28, %v1847_v39  ;;  %v715_v48 = vmul.f32 %v711_v28, %v1852_v42  ;;  %v795_v55 = vmul.f32 %v792_v10, %v1847_v39 }
 0x3cd   :  { %v794_v56 = vmul.f32 %v792_v10, %v1844_v37  ;;  %v796_v59 = vmul.f32 %v792_v10, %v1852_v42  ;;  %v694_v27 = vmul.f32 %v1844_v37, %v1497_v13  ;;  %v695_v25 = vmul.f32 %v1847_v39, %v1499_v14 }
 0x3ce   :  { %719 = vrot.lane.b32.xlu0 %v713_v40, %s1412_s21  ;;  %v1015_v44 = vpop.permute.xlu0 %1014  ;;  %721 = vrot.lane.b32.xlu1 %v714_v41, %s1412_s21  ;;  %v1013_v45 = vpop.permute.xlu1 %1012  ;;  %v876_v36 = vmul.f32 %v873_v22, %v1847_v39  ;;  %v875_v23 = vmul.f32 %v873_v22, %v1844_v37  ;;  %v732_v40 = vmul.f32 %v1847_v39, %v1603_v43 }
 0x3cf   :  { %v1857_v47 = vsel %vm79_vm0, 0.0, %v1013_v45  ;;  %v1862_v50 = vsel %vm79_vm0, %v1015_v44, 0.0  ;;  %v1865_v51 = vsel %vm79_vm0, %v1013_v45, %v1015_v44  ;;  %v1895_v10 = vmul.f32 %v700_v33, %v695_v25 }
 0x3d0   :  { %v1040_v18 = vmul.f32 %v1038_v2, %v1857_v47  ;;  %v1042_v52 = vmul.f32 %v1038_v2, %v1862_v50  ;;  %v1041_v53 = vmul.f32 %v1038_v2, %v1865_v51  ;;  %v1118_v58 = vmul.f32 %v1116_v11, %v1857_v47 }
 0x3d1   :  { %v1120_v61 = vmul.f32 %v1116_v11, %v1862_v50  ;;  %v1119_v24 = vmul.f32 %v1116_v11, %v1865_v51  ;;  %v1022_v62 = vmul.f32 %v1857_v47, %v1497_v13  ;;  %v1023_v28 = vmul.f32 %v1865_v51, %v1499_v14 }
 0x3d2   :  { %723 = vrot.lane.b32.xlu0 %v715_v48, %s1412_s21  ;;  %1046 = vrot.lane.b32.xlu1 %v1040_v18, %s1412_s21  ;;  %v1893_v2 = vmul.f32 %v700_v33, %v694_v27  ;;  %v1196_v13 = vmul.f32 %v1194_v21, %v1857_v47  ;;  %v877_v14 = vmul.f32 %v873_v22, %v1852_v42  ;;  %vm977_vm0 = vcmp.lt.s32.totalorder %v87_v0, 256 }
 0x3d3   :  { %v1897_v11 = vmul.f32 %v1028_v34, %v1022_v62  ;;  %v1899_v12 = vmul.f32 %v1028_v34, %v1023_v28  ;;  %v1198_v33 = vmul.f32 %v1194_v21, %v1862_v50  ;;  %v1197_v34 = vmul.f32 %v1194_v21, %v1865_v51 }
 0x3d4   :  { %v731_v41 = vmul.f32 %v1844_v37, %v1555_v29  ;;  %v742_v22 = vmul.f32 %v1820_v3, %v732_v40  ;;  %v1058_v45 = vmul.f32 %v1857_v47, %v1555_v29  ;;  %v733_v21 = vmul.f32 %v1852_v42, %v1567_v31 }
 0x3d5   :  { %v1086_v27 = vmul.f32 %v1865_v51, %v1613_v46  ;;  %v813_v62 = vmul.f32 %v1847_v39, %v1637_v54  ;;  %v1136_v28 = vmul.f32 %v1857_v47, %v1573_v32  ;;  %v1163_v40 = vmul.f32 %v1857_v47, %v1587_v38 }
 0x3d6   :  { %1050 = vrot.lane.b32.xlu1 %v1042_v52, %s1412_s21  ;;  %1048 = vrot.lane.b32.xlu0 %v1041_v53, %s1412_s21  ;;  %v741_v44 = vmul.f32 %v1820_v3, %v731_v41  ;;  %v1067_v48 = vmul.f32 %v1822_v5, %v1058_v45  ;;  %v743_v18 = vmul.f32 %v1820_v3, %v733_v21 }
 0x3d7   :  { %v1060_v52 = vmul.f32 %v1862_v50, %v1567_v31  ;;  %v1059_v53 = vmul.f32 %v1865_v51, %v1603_v43  ;;  %v759_v3 = vmul.f32 %v1844_v37, %v1561_v30  ;;  %v1095_v25 = vmul.f32 %v1826_v9, %v1086_v27 }
 0x3d8   :  { %v1172_v41 = vmul.f32 %v1837_v20, %v1163_v40  ;;  %v1164_v45 = vmul.f32 %v1865_v51, %v1655_v60 }
 0x3d9   :  { %v1069_v29 = vmul.f32 %v1822_v5, %v1060_v52  ;;  %v769_v43 = vmul.f32 %v1824_v7, %v759_v3  ;;  %v1216_v52 = vmul.f32 %v1862_v50, %v1663_v63 }
 0x3da   :  { %802 = vrot.lane.b32.xlu1 %v795_v55, %s1414_s23  ;;  %800 = vrot.lane.b32.xlu0 %v794_v56, %s1414_s23  ;;  %v1068_v55 = vmul.f32 %v1822_v5, %v1059_v53  ;;  %v760_v56 = vmul.f32 %v1847_v39, %v1613_v46  ;;  %v761_v5 = vmul.f32 %v1852_v42, %v1579_v35 }
 0x3db   :  { %v1173_v21 = vmul.f32 %v1837_v20, %v1164_v45  ;;  %v1215_v53 = vmul.f32 %v1865_v51, %v1675_v4 }
 0x3dc   :  { %v770_v31 = vmul.f32 %v1824_v7, %v760_v56 }
 0x3de   :  { %1124 = vrot.lane.b32.xlu1 %v1118_v58, %s1414_s23  ;;  %804 = vrot.lane.b32.xlu0 %v796_v59, %s1414_s23  ;;  %v1085_v58 = vmul.f32 %v1857_v47, %v1561_v30 }
 0x3e0   :  { %v1094_v59 = vmul.f32 %v1826_v9, %v1085_v58 }
 0x3e2   :  { %1128 = vrot.lane.b32.xlu1 %v1120_v61, %s1414_s23  ;;  %1126 = vrot.lane.b32.xlu0 %v1119_v24, %s1414_s23  ;;  %v771_v61 = vmul.f32 %v1824_v7, %v761_v5  ;;  %v1087_v24 = vmul.f32 %v1862_v50, %v1579_v35  ;;  %v812_v7 = vmul.f32 %v1844_v37, %v1573_v32 }
 0x3e3   :  { %v823_v35 = vmul.f32 %v1831_v15, %v813_v62 }
 0x3e4   :  { %v1096_v30 = vmul.f32 %v1826_v9, %v1087_v24  ;;  %v822_v46 = vmul.f32 %v1831_v15, %v812_v7  ;;  %v814_v9 = vmul.f32 %v1852_v42, %v1621_v49 }
 0x3e6   :  { %883 = vrot.lane.b32.xlu1 %v876_v36, %s1413_s22  ;;  %881 = vrot.lane.b32.xlu0 %v875_v23, %s1413_s22  ;;  %v1145_v36 = vmul.f32 %v1833_v16, %v1136_v28  ;;  %v824_v23 = vmul.f32 %v1831_v15, %v814_v9  ;;  %v840_v15 = vmul.f32 %v1844_v37, %v1587_v38 }
 0x3ea   :  { %1202 = vrot.lane.b32.xlu1 %v1196_v13, %s1413_s22  ;;  %885 = vrot.lane.b32.xlu0 %v877_v14, %s1413_s22  ;;  %v1138_v13 = vmul.f32 %v1862_v50, %v1621_v49  ;;  %v1137_v14 = vmul.f32 %v1865_v51, %v1637_v54  ;;  %v850_v54 = vmul.f32 %v1835_v19, %v840_v15 }
 0x3ec   :  { %v1147_v32 = vmul.f32 %v1833_v16, %v1138_v13 }
 0x3ee   :  { %1206 = vrot.lane.b32.xlu1 %v1198_v33, %s1413_s22  ;;  %1204 = vrot.lane.b32.xlu0 %v1197_v34, %s1413_s22  ;;  %v1146_v33 = vmul.f32 %v1833_v16, %v1137_v14  ;;  %v841_v34 = vmul.f32 %v1847_v39, %v1655_v60  ;;  %v842_v16 = vmul.f32 %v1852_v42, %v1645_v57 }
 0x3f0   :  { %v851_v49 = vmul.f32 %v1835_v19, %v841_v34 }
 0x3f2   :  { %749 = vrot.lane.b32.xlu1 %v742_v22, %s1415_s24  ;;  %747 = vrot.lane.b32.xlu0 %v741_v44, %s1415_s24  ;;  %v852_v22 = vmul.f32 %v1835_v19, %v842_v16  ;;  %v1165_v44 = vmul.f32 %v1862_v50, %v1645_v57  ;;  %v893_v19 = vmul.f32 %v1844_v37, %v1665_v1 }
 0x3f4   :  { %v1174_v38 = vmul.f32 %v1837_v20, %v1165_v44  ;;  %v903_v60 = vmul.f32 %v1839_v26, %v893_v19  ;;  %v895_v20 = vmul.f32 %v1852_v42, %v1663_v63  ;;  %v1224_v42 = vmul.f32 %v1841_v17, %v1215_v53 }
 0x3f6   :  { %1073 = vrot.lane.b32.xlu1 %v1067_v48, %s1415_s24  ;;  %751 = vrot.lane.b32.xlu0 %v743_v18, %s1415_s24  ;;  %v894_v48 = vmul.f32 %v1847_v39, %v1675_v4  ;;  %v1214_v18 = vmul.f32 %v1857_v47, %v1665_v1  ;;  %v905_v39 = vmul.f32 %v1839_v26, %v895_v20  ;;  %v1253_v47 = vld [vmem:[#allocation3] sm:$0x1] }
 0x3f7   :  { %v1225_v1 = vmul.f32 %v1841_v17, %v1216_v52 }
 0x3f8   :  { %v904_v57 = vmul.f32 %v1839_v26, %v894_v48  ;;  %v1223_v37 = vmul.f32 %v1841_v17, %v1214_v18  ;;  %v933_v26 = vld [vmem:[#allocation3] sm:$0x1] }
 0x3fa   :  { %1077 = vrot.lane.b32.xlu1 %v1069_v29, %s1415_s24  ;;  %1075 = vrot.lane.b32.xlu0 %v1068_v55, %s1415_s24 }
 0x3fe   :  { %777 = vrot.lane.b32.xlu1 %v770_v31, %s1416_s25  ;;  %775 = vrot.lane.b32.xlu0 %v769_v43, %s1416_s25 }
 0x402   :  { %1100 = vrot.lane.b32.xlu1 %v1094_v59, %s1416_s25  ;;  %779 = vrot.lane.b32.xlu0 %v771_v61, %s1416_s25 }
 0x406   :  { %1104 = vrot.lane.b32.xlu1 %v1096_v30, %s1416_s25  ;;  %1102 = vrot.lane.b32.xlu0 %v1095_v25, %s1416_s25 }
 0x40a   :  { %830 = vrot.lane.b32.xlu1 %v823_v35, %s1418_s27  ;;  %828 = vrot.lane.b32.xlu0 %v822_v46, %s1418_s27 }
 0x40e   :  { %1151 = vrot.lane.b32.xlu1 %v1145_v36, %s1418_s27  ;;  %832 = vrot.lane.b32.xlu0 %v824_v23, %s1418_s27 }
 0x412   :  { %1155 = vrot.lane.b32.xlu1 %v1147_v32, %s1418_s27  ;;  %1153 = vrot.lane.b32.xlu0 %v1146_v33, %s1418_s27 }
 0x416   :  { %858 = vrot.lane.b32.xlu1 %v851_v49, %s1417_s26  ;;  %856 = vrot.lane.b32.xlu0 %v850_v54, %s1417_s26 }
 0x41a   :  { %1178 = vrot.lane.b32.xlu1 %v1172_v41, %s1417_s26  ;;  %860 = vrot.lane.b32.xlu0 %v852_v22, %s1417_s26 }
 0x41e   :  { %1182 = vrot.lane.b32.xlu1 %v1174_v38, %s1417_s26  ;;  %1180 = vrot.lane.b32.xlu0 %v1173_v21, %s1417_s26 }
 0x422   :  { %911 = vrot.lane.b32.xlu1 %v904_v57, %s1419_s28  ;;  %909 = vrot.lane.b32.xlu0 %v903_v60, %s1419_s28 }
 0x426   :  { %1229 = vrot.lane.b32.xlu1 %v1223_v37, %s1419_s28  ;;  %913 = vrot.lane.b32.xlu0 %v905_v39, %s1419_s28 }
 0x42a   :  { %1233 = vrot.lane.b32.xlu1 %v1225_v1, %s1419_s28  ;;  %1231 = vrot.lane.b32.xlu0 %v1224_v42, %s1419_s28 }
 0x42e   :  { %1256 = vperm.xlu1 %1382, %v1253_v47   ;;  %936 = vperm.xlu0 %1381, %v933_v26  }
 0x440   :  { %v720_v63 = vpop.permute.xlu0 %719  ;;  %v722_v50 = vpop.permute.xlu1 %721 }
 0x441   :  { %v725_v4 = vsel %vm109_vm6, %v720_v63, %v722_v50 }
 0x442   :  { %v729_v51 = vadd.f32 %v725_v4, %v1893_v2 }
 0x444   :  { %v724_v29 = vpop.permute.xlu0 %723  ;;  %v1047_v55 = vpop.permute.xlu1 %1046 }
 0x445   :  { %v726_v56 = vsel %vm109_vm6, %v722_v50, %v724_v29 }
 0x446   :  { %v730_v17 = vadd.f32 %v726_v56, %v1895_v10 }
 0x448   :  { %v1049_v3 = vpop.permute.xlu0 %1048  ;;  %v1051_v31 = vpop.permute.xlu1 %1050 }
 0x449   :  { %v1052_v43 = vsel %vm109_vm6, %v1047_v55, %v1049_v3  ;;  %v1053_v58 = vsel %vm109_vm6, %v1049_v3, %v1051_v31 }
 0x44a   :  { %v1056_v5 = vadd.f32 %v1052_v43, %v1897_v11  ;;  %v1057_v59 = vadd.f32 %v1053_v58, %v1899_v12 }
 0x44c   :  { %v801_v61 = vpop.permute.xlu0 %800  ;;  %v803_v24 = vpop.permute.xlu1 %802 }
 0x44d   :  { %v806_v2 = vsel %vm187_vm7, %v801_v61, %v803_v24 }
 0x450   :  { %v805_v27 = vpop.permute.xlu0 %804  ;;  %v1125_v30 = vpop.permute.xlu1 %1124 }
 0x451   :  { %v807_v25 = vsel %vm187_vm7, %v803_v24, %v805_v27 }
 0x454   :  { %v1127_v62 = vpop.permute.xlu0 %1126  ;;  %v1129_v10 = vpop.permute.xlu1 %1128 }
 0x455   :  { %v1130_v7 = vsel %vm187_vm7, %v1125_v30, %v1127_v62  ;;  %v1131_v35 = vsel %vm187_vm7, %v1127_v62, %v1129_v10 }
 0x458   :  { %v882_v46 = vpop.permute.xlu0 %881  ;;  %v884_v28 = vpop.permute.xlu1 %883 }
 0x459   :  { %v887_v11 = vsel %vm256_vm8, %v882_v46, %v884_v28 }
 0x45c   :  { %v886_v9 = vpop.permute.xlu0 %885  ;;  %v2046_v12 = vpop.permute.xlu1 %1202 }
 0x45d   :  { %v888_v10 = vsel %vm256_vm8, %v884_v28, %v886_v9 }
 0x460   :  { %v2048_v36 = vpop.permute.xlu0 %1204  ;;  %v2050_v23 = vpop.permute.xlu1 %1206 }
 0x464   :  { %v748_v13 = vpop.permute.xlu0 %747  ;;  %v750_v14 = vpop.permute.xlu1 %749 }
 0x465   :  { %v753_v49 = vsel %vm146_vm9, %v748_v13, %v750_v14 }
 0x466   :  { %v757_v54 = vadd.f32 %v753_v49, %v729_v51 }
 0x468   :  { %v752_v32 = vpop.permute.xlu0 %751  ;;  %v1074_v33 = vpop.permute.xlu1 %1073 }
 0x469   :  { %v754_v41 = vsel %vm146_vm9, %v750_v14, %v752_v32 }
 0x46a   :  { %v758_v45 = vadd.f32 %v754_v41, %v730_v17 }
 0x46c   :  { %v1076_v34 = vpop.permute.xlu0 %1075  ;;  %v1078_v15 = vpop.permute.xlu1 %1077 }
 0x46d   :  { %v1079_v19 = vsel %vm146_vm9, %v1074_v33, %v1076_v34  ;;  %v1080_v57 = vsel %vm146_vm9, %v1076_v34, %v1078_v15 }
 0x46e   :  { %v1083_v20 = vadd.f32 %v1079_v19, %v1056_v5  ;;  %v1084_v37 = vadd.f32 %v1080_v57, %v1057_v59 }
 0x470   :  { %v776_v40 = vpop.permute.xlu0 %775  ;;  %v778_v16 = vpop.permute.xlu1 %777 }
 0x471   :  { %v781_v22 = vsel %vm174_vm10, %v776_v40, %v778_v16 }
 0x472   :  { %v785_v44 = vadd.f32 %v781_v22, %v757_v54 }
 0x474   :  { %v780_v38 = vpop.permute.xlu0 %779  ;;  %v1101_v21 = vpop.permute.xlu1 %1100  ;;  %v810_v48 = vadd.f32 %v806_v2, %v785_v44 }
 0x475   :  { %v782_v60 = vsel %vm174_vm10, %v778_v16, %v780_v38  ;;  %v1208_v38 = vsel %vm256_vm8, %v2046_v12, %v2048_v36 }
 0x476   :  { %v786_v18 = vadd.f32 %v782_v60, %v758_v45 }
 0x478   :  { %v1103_v39 = vpop.permute.xlu0 %1102  ;;  %v1105_v52 = vpop.permute.xlu1 %1104  ;;  %v811_v53 = vadd.f32 %v807_v25, %v786_v18 }
 0x479   :  { %v1106_v1 = vsel %vm174_vm10, %v1101_v21, %v1103_v39  ;;  %v1107_v42 = vsel %vm174_vm10, %v1103_v39, %v1105_v52  ;;  %v1209_v21 = vsel %vm256_vm8, %v2048_v36, %v2050_v23 }
 0x47a   :  { %v1110_v47 = vadd.f32 %v1106_v1, %v1083_v20  ;;  %v1111_v26 = vadd.f32 %v1107_v42, %v1084_v37 }
 0x47c   :  { %v829_v63 = vpop.permute.xlu0 %828  ;;  %v831_v50 = vpop.permute.xlu1 %830  ;;  %v1134_v4 = vadd.f32 %v1130_v7, %v1110_v47  ;;  %v1135_v51 = vadd.f32 %v1131_v35, %v1111_v26 }
 0x47d   :  { %v834_v3 = vsel %vm215_vm11, %v829_v63, %v831_v50 }
 0x47e   :  { %v838_v31 = vadd.f32 %v834_v3, %v810_v48 }
 0x480   :  { %v833_v29 = vpop.permute.xlu0 %832  ;;  %v1152_v55 = vpop.permute.xlu1 %1151 }
 0x481   :  { %v835_v5 = vsel %vm215_vm11, %v831_v50, %v833_v29 }
 0x482   :  { %v839_v24 = vadd.f32 %v835_v5, %v811_v53 }
 0x484   :  { %v1154_v56 = vpop.permute.xlu0 %1153  ;;  %v1156_v17 = vpop.permute.xlu1 %1155 }
 0x485   :  { %v1157_v13 = vsel %vm215_vm11, %v1152_v55, %v1154_v56  ;;  %v1158_v14 = vsel %vm215_vm11, %v1154_v56, %v1156_v17 }
 0x486   :  { %v1161_v49 = vadd.f32 %v1157_v13, %v1134_v4  ;;  %v1162_v54 = vadd.f32 %v1158_v14, %v1135_v51 }
 0x488   :  { %v857_v43 = vpop.permute.xlu0 %856  ;;  %v859_v58 = vpop.permute.xlu1 %858 }
 0x489   :  { %v862_v59 = vsel %vm243_vm12, %v857_v43, %v859_v58 }
 0x48a   :  { %v866_v61 = vadd.f32 %v862_v59, %v838_v31 }
 0x48c   :  { %v861_v2 = vpop.permute.xlu0 %860  ;;  %v1179_v27 = vpop.permute.xlu1 %1178  ;;  %v891_v30 = vadd.f32 %v887_v11, %v866_v61 }
 0x48d   :  { %v863_v25 = vsel %vm243_vm12, %v859_v58, %v861_v2 }
 0x48e   :  { %v867_v62 = vadd.f32 %v863_v25, %v839_v24 }
 0x490   :  { %v1181_v7 = vpop.permute.xlu0 %1180  ;;  %v1183_v35 = vpop.permute.xlu1 %1182  ;;  %v892_v46 = vadd.f32 %v888_v10, %v867_v62 }
 0x491   :  { %v1184_v34 = vsel %vm243_vm12, %v1179_v27, %v1181_v7  ;;  %v1185_v15 = vsel %vm243_vm12, %v1181_v7, %v1183_v35 }
 0x492   :  { %v1188_v16 = vadd.f32 %v1184_v34, %v1161_v49  ;;  %v1189_v28 = vadd.f32 %v1185_v15, %v1162_v54  ;;  %v1421_v54 = vmov 1966171168  }
 0x494   :  { %v910_v32 = vpop.permute.xlu0 %909  ;;  %v912_v33 = vpop.permute.xlu1 %911  ;;  %v1212_v57 = vadd.f32 %v1208_v38, %v1188_v16  ;;  %v1213_v60 = vadd.f32 %v1209_v21, %v1189_v28 }
 0x495   :  { %v915_v11 = vsel %vm284_vm13, %v910_v32, %v912_v33 }
 0x496   :  { %v919_v40 = vadd.f32 %v915_v11, %v891_v30 }
 0x498   :  { %v914_v9 = vpop.permute.xlu0 %913  ;;  %v1230_v41 = vpop.permute.xlu1 %1229  ;;  %v921_v22 = vrot.slane %v919_v40, 4 }
 0x499   :  { %v916_v44 = vsel %vm284_vm13, %v912_v33, %v914_v9 }
 0x49a   :  { %v920_v45 = vadd.f32 %v916_v44, %v892_v46  ;;  %v922_v20 = vadd.f32 %v921_v22, %v919_v40  ;;  %v961_v40 = vunpack.c.l.s4 %v1421_v54 }
 0x49c   :  { %v927_v48 = vrot.slane %v920_v45, 4  ;;  %v1232_v19 = vpop.permute.xlu0 %1231  ;;  %v1234_v18 = vpop.permute.xlu1 %1233  ;;  %v923_v12 = vrot.slane %v922_v20, 2  ;;  %v962_v16 = vunpack.c.0.s8 %v961_v40 }
 0x49d   :  { %v1235_v37 = vsel %vm284_vm13, %v1230_v41, %v1232_v19  ;;  %v1236_v39 = vsel %vm284_vm13, %v1232_v19, %v1234_v18 }
 0x49e   :  { %v928_v52 = vadd.f32 %v927_v48, %v920_v45  ;;  %v1239_v53 = vadd.f32 %v1235_v37, %v1212_v57  ;;  %v1240_v1 = vadd.f32 %v1236_v39, %v1213_v60  ;;  %v924_v4 = vadd.f32 %v923_v12, %v922_v20 }
 0x49f   :  { %v965_v9 = vsub.s32 %v962_v16, %v1481_v6 }
 0x4a0   :  { %v1241_v42 = vrot.slane %v1239_v53, 4  ;;  %v1247_v47 = vrot.slane %v1240_v1, 4  ;;  %v929_v26 = vrot.slane %v928_v52, 2  ;;  %v925_v56 = vrot.slane %v924_v4, 1 }
 0x4a2   :  { %v1242_v63 = vadd.f32 %v1241_v42, %v1239_v53  ;;  %v1248_v50 = vadd.f32 %v1247_v47, %v1240_v1  ;;  %v930_v51 = vadd.f32 %v929_v26, %v928_v52  ;;  %v926_v58 = vadd.f32 %v925_v56, %v924_v4 }
 0x4a4   :  { %v1243_v36 = vrot.slane %v1242_v63, 2  ;;  %v1249_v23 = vrot.slane %v1248_v50, 2  ;;  %v931_v17 = vrot.slane %v930_v51, 1 }
 0x4a6   :  { %v1244_v29 = vadd.f32 %v1243_v36, %v1242_v63  ;;  %v1250_v55 = vadd.f32 %v1249_v23, %v1248_v50  ;;  %v932_v5 = vadd.f32 %v931_v17, %v930_v51 }
 0x4a8   :  { %v1245_v3 = vrot.slane %v1244_v29, 1  ;;  %v1251_v31 = vrot.slane %v1250_v55, 1 }
 0x4aa   :  { %v1246_v24 = vadd.f32 %v1245_v3, %v1244_v29  ;;  %v1252_v2 = vadd.f32 %v1251_v31, %v1250_v55 }
 0x4ad   :  { %v937_v43 = vpop.permute.xlu0 %936  ;;  %v1257_v59 = vpop.permute.xlu1 %1256 }
 0x4ae   :  { %v942_v61 = vrot.slane %v937_v43, %v1487_v8  ;;  %v1262_v27 = vrot.slane %v1257_v59, %v1487_v8 }
 0x4b0   :  { %v943_v30 = vadd.f32 %v942_v61, %v926_v58  ;;  %v944_v25 = vadd.f32 %v942_v61, %v932_v5  ;;  %v1263_v62 = vadd.f32 %v1262_v27, %v1246_v24  ;;  %v1264_v10 = vadd.f32 %v1262_v27, %v1252_v2 }
 0x4b2   :  { %v1317_v7 = vmul.f32 -1.442695, %v943_v30  ;;  %v1318_v35 = vmul.f32 -1.442695, %v944_v25  ;;  %v1329_v46 = vmul.f32 -1.442695, %v1263_v62 }
 0x4b3   :  { %v1330_v13 = vmul.f32 -1.442695, %v1264_v10 }
 0x4b4   :  { %1389 = vpow2.f32 %v1317_v7 }
 0x4b5   :  { %1391 = vpow2.f32 %v1318_v35 }
 0x4b6   :  { %1393 = vpow2.f32 %v1329_v46 }
 0x4b7   :  { %1395 = vpow2.f32 %v1330_v13 }
 0x4be   :  { %v1390_v14 = vpop.eup %1389 }
 0x4bf   :  { %v1392_v32 = vpop.eup %1391  ;;  %v951_v33 = vadd.f32 1.0, %v1390_v14 }
 0x4c0   :  { %v1394_v34 = vpop.eup %1393  ;;  %v952_v15 = vadd.f32 1.0, %v1392_v32 }
 0x4c1   :  { %v1396_v11 = vpop.eup %1395  ;;  %1397 = vrcp.f32 %v951_v33  ;;  %v1271_v8 = vadd.f32 1.0, %v1394_v34 }
 0x4c2   :  { %1399 = vrcp.f32 %v952_v15  ;;  %v1272_v49 = vadd.f32 1.0, %v1396_v11 }
 0x4c3   :  { %1401 = vrcp.f32 %v1271_v8 }
 0x4c4   :  { %1403 = vrcp.f32 %v1272_v49 }
 0x4cb   :  { %v1398_v28 = vpop.eup %1397 }
 0x4cc   :  { %v1400_v41 = vpop.eup %1399 }
 0x4cd   :  { %v1402_v22 = vpop.eup %1401  ;;  %v959_v44 = vcombine.low %v1398_v28, %v1400_v41 }
 0x4ce   :  { %v1404_v45 = vpop.eup %1403 }
 0x4cf   :  { %v966_v38 = vrot.slane %v959_v44, %v965_v9  ;;  %v1279_v21 = vcombine.low %v1402_v22, %v1404_v45 }
 0x4d1   :  { %v973_v48 = vrot.slane %v966_v38, %v965_v9  ;;  %v1286_v19 = vrot.slane %v1279_v21, %v965_v9 }
 0x4d3   :  { %979 = vst.msk [vmem:[%s2098_s9] sm:$0x3] %vm977_vm0, %v973_v48  ;;  %v1293_v57 = vrot.slane %v1286_v19, %v965_v9 }
 0x4d5   :  { %1331 = vst.msk [vmem:[%s2098_s9 + $0x2] sm:$0x3] %vm977_vm0, %v1293_v57 }

</bundles_post_ra>
